<compile_context>
chip_gen: v5e
topology: v5e:2x2
jax: 0.10.0
libtpu: 0.0.40
codegen_flags: <defaults>
</compile_context>

<pallas_src>
import functools

import jax
import jax.numpy as jnp
from jax.experimental import pallas as pl
from jax.experimental.pallas import tpu as pltpu


# ----------------------------- synthetic params ------------------------------
class Params:
    word_vocab_size = 64
    word_embed_size = 32
    encoder_rnn_size = 32
    latent_variable_size = 16
    decoder_type = "dilation"
    word_is_char = True
    # (out_channels, in_channels, kernel_width) per dilated layer
    decoder_kernels = [(64, 32 + 16, 3), (64, 64, 3)]
    decoder_dilations = [1, 2]


_CP = 128     # lane-aligned channel width inside the decoder kernel
_VP = 128     # lane-aligned vocab width of the decoder output block

_VMEM = pl.BlockSpec(memory_space=pltpu.MemorySpace.VMEM)


# ===================== fused BiGRU encoder + latent kernel ====================
def bigru_latent_kernel(ids_ref, emb_ref, wih_ref, bih_ref, whh_ref, bhh_ref,
                        wmu_ref, bmu_ref, wlv_ref, blv_ref, eps_ref,
                        z_ref, kld_ref):
    """ids_ref: [S*B, 1] int32 time-major token ids.  Outputs z [B,L], kld [1,1].

    Column layout of all gate tensors (gates at their REAL width H):
      [ r_f | r_b | z_f | z_b | n_f | n_b ]   -> 6*H columns total.
    whh_ref is block-diagonal [2H, 6H]: rows 0:H (h_fwd) feed the *_f columns,
    rows H:2H (h_bwd) feed the *_b columns, so the [B,2H]x[2H,6H] matmul output
    is fully used and the state h=[h_f|h_b] is directly the next-step operand.
    """
    SB = ids_ref.shape[0]
    B = eps_ref.shape[0]
    S = SB // B
    V = emb_ref.shape[0]
    H = whh_ref.shape[0] // 2
    G = 2 * H                                   # width of one interleaved gate pair

    # ---- fused embedding lookup (exact one-hot matmul) + hoisted input projection ----
    vocab = jax.lax.broadcasted_iota(jnp.int32, (SB, V), 1)
    onehot = (ids_ref[...] == vocab).astype(jnp.float32)                  # [S*B, V]
    x = jnp.dot(onehot, emb_ref[...], preferred_element_type=jnp.float32)  # [S*B, E]
    gi_all = jnp.dot(x, wih_ref[...],
                     preferred_element_type=jnp.float32) + bih_ref[...]    # [S*B, 6H]

    whh = whh_ref[...]
    bhh = bhh_ref[...]

    # lanes belonging to the forward direction (r_f / z_f / n_f blocks)
    lane = jax.lax.broadcasted_iota(jnp.int32, (1, 6 * H), 1)
    is_fwd = ((lane < H)
              | ((lane >= 2 * H) & (lane < 3 * H))
              | ((lane >= 4 * H) & (lane < 5 * H)))

    # h = [h_fwd (lanes 0:H) | h_bwd (lanes H:2H)]
    h = jnp.zeros((B, 2 * H), jnp.float32)

    # Short, fixed trip-count recurrence -> fully unrolled static loop (S small).
    for t in range(S):
        gi_f = gi_all[t * B:(t + 1) * B, :]                 # fwd gates, time t
        gi_b = gi_all[(S - 1 - t) * B:(S - t) * B, :]       # bwd gates, time S-1-t
        gi = jnp.where(is_fwd, gi_f, gi_b)                  # off the serial chain
        # single MXU matmul per step, output fully used by both directions
        gh = jnp.dot(h, whh, preferred_element_type=jnp.float32) + bhh
        r = jax.nn.sigmoid(gi[:, 0:G] + gh[:, 0:G])
        zg = jax.nn.sigmoid(gi[:, G:2 * G] + gh[:, G:2 * G])
        n = jnp.tanh(gi[:, 2 * G:3 * G] + r * gh[:, 2 * G:3 * G])
        h = (1.0 - zg) * n + zg * h

    # ---- fused latent heads (h == concat(h_fwd, h_bwd) already) ----
    mu = jnp.dot(h, wmu_ref[...], preferred_element_type=jnp.float32) + bmu_ref[...]
    logvar = jnp.dot(h, wlv_ref[...], preferred_element_type=jnp.float32) + blv_ref[...]
    std = jnp.exp(0.5 * logvar)
    z_ref[...] = eps_ref[...] * std + mu
    # kld = (-0.5 * sum(logvar - mu^2 - exp(logvar) + 1, dim=1)).mean()
    kld_b = -0.5 * jnp.sum(logvar - mu * mu - jnp.exp(logvar) + 1.0,
                           axis=1, keepdims=True)                          # [B, 1]
    kld_ref[...] = jnp.zeros((1, 1), jnp.float32) + jnp.sum(kld_b) * (1.0 / B)


def bigru_latent(enc_ids, eps, fw):
    B, L = eps.shape
    z, kld = pl.pallas_call(
        bigru_latent_kernel,
        out_shape=(jax.ShapeDtypeStruct((B, L), jnp.float32),
                   jax.ShapeDtypeStruct((1, 1), jnp.float32)),
        in_specs=[_VMEM] * 11,
        out_specs=(_VMEM, _VMEM),
    )(enc_ids, fw["word_embed"], fw["wih_cat"], fw["bih_cat"], fw["whh_bd"],
      fw["bhh_cat"], fw["w_mu"], fw["b_mu"], fw["w_lv"], fw["b_lv"], eps)
    return z, kld


# ========================== fused dilated decoder kernel =====================
def fused_decoder_kernel(*refs, dilations, t_pad, cp, has_mask):
    """One batch element per grid step; everything stays in registers/VMEM.

    refs = (ids [T,1], z [1,L], [mask [T,E]], emb [V,E],
            (w_i [K*cp, cp], b_i [1,cp]) per layer, fc_w [cp,Vp], fc_b [1,Vp],
            out [t_pad, Vp])
    """
    nl = len(dilations)
    ids_ref, z_ref = refs[0], refs[1]
    base = 3 if has_mask else 2
    mask_ref = refs[2] if has_mask else None
    emb_ref = refs[base]
    conv_w = [refs[base + 1 + 2 * i] for i in range(nl)]
    conv_b = [refs[base + 2 + 2 * i] for i in range(nl)]
    fcw_ref = refs[base + 1 + 2 * nl]
    fcb_ref = refs[base + 2 + 2 * nl]
    o_ref = refs[base + 3 + 2 * nl]

    T = ids_ref.shape[0]
    V = emb_ref.shape[0]
    E = emb_ref.shape[1]
    L = z_ref.shape[1]

    # ---- in-kernel embedding lookup (exact one-hot matmul) ----
    vocab = jax.lax.broadcasted_iota(jnp.int32, (T, V), 1)
    onehot = (ids_ref[...] == vocab).astype(jnp.float32)                  # [T, V]
    demb = jnp.dot(onehot, emb_ref[...], preferred_element_type=jnp.float32)  # [T, E]
    if has_mask:
        demb = demb * mask_ref[...]

    # ---- conv-1 input composed as one register value: [demb | z | 0-lanes], rows -> t_pad
    zrow = jnp.broadcast_to(z_ref[...], (T, L))
    x = jnp.concatenate(
        [demb, zrow, jnp.zeros((T, cp - E - L), jnp.float32)], axis=1)     # [T, cp]
    x = jnp.concatenate([x, jnp.zeros((t_pad - T, cp), jnp.float32)], axis=0)  # [t_pad, cp]

    for w_ref, b_ref, dil in zip(conv_w, conv_b, dilations):
        K = w_ref.shape[0] // cp
        pad = (K - 1) * dil
        xp = jnp.concatenate([jnp.zeros((pad, cp), jnp.float32), x], axis=0)   # causal pad
        # im2col: K shifted views side by side on lanes -> ONE matmul per layer
        taps = jnp.concatenate(
            [xp[k * dil:k * dil + t_pad, :] for k in range(K)], axis=1)        # [t_pad, K*cp]
        x = jnp.maximum(
            jnp.dot(taps, w_ref[...], preferred_element_type=jnp.float32)
            + b_ref[...], 0.0)                                                 # [t_pad, cp]

    # lane/sublane-dense [t_pad, 128] store; wrapper slices [:T, :V]
    o_ref[...] = jnp.dot(x, fcw_ref[...],
                         preferred_element_type=jnp.float32) + fcb_ref[...]


def fused_decoder(params, fw, dec_ids, z, drop_mask=None):
    B, T, _ = dec_ids.shape
    L = z.shape[1]
    E = fw["word_embed"].shape[1]
    Vp = fw["fc_w_pad"].shape[1]
    dils = tuple(params.decoder_dilations)
    t_pad = ((T + 7) // 8) * 8                                 # sublane-align time
    has_mask = drop_mask is not None

    z3 = z[:, None, :]                                         # [B, 1, L]

    in_specs = [
        pl.BlockSpec((pl.Squeezed(), T, 1), lambda i: (i, 0, 0)),
        pl.BlockSpec((pl.Squeezed(), 1, L), lambda i: (i, 0, 0)),
    ]
    inputs = [dec_ids, z3]
    if has_mask:
        in_specs.append(pl.BlockSpec((pl.Squeezed(), T, E), lambda i: (i, 0, 0)))
        inputs.append(drop_mask)
    in_specs.append(pl.BlockSpec(fw["word_embed"].shape, lambda i: (0, 0)))
    inputs.append(fw["word_embed"])
    for w, b in zip(fw["conv_w_im2col"], fw["conv_b_pad"]):
        in_specs.append(pl.BlockSpec(w.shape, lambda i: (0, 0)))
        in_specs.append(pl.BlockSpec(b.shape, lambda i: (0, 0)))
        inputs += [w, b]
    in_specs.append(pl.BlockSpec(fw["fc_w_pad"].shape, lambda i: (0, 0)))
    in_specs.append(pl.BlockSpec(fw["fc_b_pad"].shape, lambda i: (0, 0)))
    inputs += [fw["fc_w_pad"], fw["fc_b_pad"]]

    kernel = functools.partial(fused_decoder_kernel, dilations=dils, t_pad=t_pad,
                               cp=_CP, has_mask=has_mask)

    return pl.pallas_call(
        kernel,
        out_shape=jax.ShapeDtypeStruct((B, t_pad, Vp), jnp.float32),
        grid=(B,),
        in_specs=in_specs,
        out_specs=pl.BlockSpec((pl.Squeezed(), t_pad, Vp), lambda i: (i, 0, 0)),
        compiler_params=pltpu.CompilerParams(
            dimension_semantics=("parallel",)),                # 2-core sharding on v7x
    )(*inputs)


# ========================= canonical weights & fused layouts =================
def init_weights(params, key):
    E, H = params.word_embed_size, params.encoder_rnn_size
    L, V = params.latent_variable_size, params.word_vocab_size

    def dense(k, shape, fan_in):
        return jax.random.normal(k, shape, jnp.float32) / jnp.sqrt(jnp.float32(fan_in))

    ks = list(jax.random.split(key, 24))
    w = {
        "word_embed": 0.1 * jax.random.normal(ks[0], (V, E), jnp.float32),
        # bidirectional GRU (gates r,z,n stacked on last axis)
        "enc_wih_f": dense(ks[1], (E, 3 * H), E),
        "enc_whh_f": dense(ks[2], (H, 3 * H), H),
        "enc_bih_f": 0.01 * jax.random.normal(ks[3], (1, 3 * H), jnp.float32),
        "enc_bhh_f": 0.01 * jax.random.normal(ks[4], (1, 3 * H), jnp.float32),
        "enc_wih_b": dense(ks[5], (E, 3 * H), E),
        "enc_whh_b": dense(ks[6], (H, 3 * H), H),
        "enc_bih_b": 0.01 * jax.random.normal(ks[7], (1, 3 * H), jnp.float32),
        "enc_bhh_b": 0.01 * jax.random.normal(ks[8], (1, 3 * H), jnp.float32),
        # context -> mu / logvar
        "w_mu": dense(ks[9], (2 * H, L), 2 * H),
        "b_mu": 0.01 * jax.random.normal(ks[10], (1, L), jnp.float32),
        "w_lv": dense(ks[11], (2 * H, L), 2 * H),
        "b_lv": 0.01 * jax.random.normal(ks[12], (1, L), jnp.float32),
    }
    conv_w, conv_b = [], []
    for li, (cout, cin, kw) in enumerate(params.decoder_kernels):
        conv_w.append(dense(ks[13 + 2 * li], (kw, cin, cout), cin * kw))
        conv_b.append(0.01 * jax.random.normal(ks[14 + 2 * li], (1, cout), jnp.float32))
    w["conv_w"], w["conv_b"] = conv_w, conv_b
    c_last = params.decoder_kernels[-1][0]
    w["fc_w"] = dense(ks[20], (c_last, V), c_last)
    w["fc_b"] = 0.01 * jax.random.normal(ks[21], (1, V), jnp.float32)
    return w


def prepare_fused_weights(params, wts):
    """Re-lay out canonical weights into the fused / interleaved kernel forms."""
    H = params.encoder_rnn_size
    V = params.word_vocab_size

    def interleave(wf, wb):
        # [..., 3H] x2 -> [..., 6H] as [r_f|r_b|z_f|z_b|n_f|n_b]
        parts = []
        for g in range(3):
            parts.append(wf[..., g * H:(g + 1) * H])
            parts.append(wb[..., g * H:(g + 1) * H])
        return jnp.concatenate(parts, axis=-1)

    # block-diagonal recurrent weights: rows 0:H (h_fwd) -> fwd gate columns,
    # rows H:2H (h_bwd) -> bwd gate columns.
    whh_bd = jnp.zeros((2 * H, 6 * H), jnp.float32)
    for g in range(3):
        whh_bd = whh_bd.at[0:H, (2 * g) * H:(2 * g + 1) * H].set(
            wts["enc_whh_f"][:, g * H:(g + 1) * H])
        whh_bd = whh_bd.at[H:2 * H, (2 * g + 1) * H:(2 * g + 2) * H].set(
            wts["enc_whh_b"][:, g * H:(g + 1) * H])

    fw = {
        "word_embed": wts["word_embed"],
        "wih_cat": interleave(wts["enc_wih_f"], wts["enc_wih_b"]),   # [E, 6H]
        "bih_cat": interleave(wts["enc_bih_f"], wts["enc_bih_b"]),   # [1, 6H]
        "whh_bd": whh_bd,                                            # [2H, 6H]
        "bhh_cat": interleave(wts["enc_bhh_f"], wts["enc_bhh_b"]),   # [1, 6H]
        "w_mu": wts["w_mu"], "b_mu": wts["b_mu"],
        "w_lv": wts["w_lv"], "b_lv": wts["b_lv"],
    }

    # im2col conv weights: [K, cin, cout] -> [K*_CP, _CP] (tap-major rows, zero padded)
    conv_w_im2col, conv_b_pad = [], []
    for w, b in zip(wts["conv_w"], wts["conv_b"]):
        K, cin, cout = w.shape
        assert cin <= _CP and cout <= _CP
        wp = jnp.zeros((K * _CP, _CP), jnp.float32)
        for k in range(K):
            wp = wp.at[k * _CP:k * _CP + cin, 0:cout].set(w[k])
        conv_w_im2col.append(wp)
        conv_b_pad.append(jnp.pad(b, ((0, 0), (0, _CP - cout))))
    fw["conv_w_im2col"], fw["conv_b_pad"] = conv_w_im2col, conv_b_pad

    c_last = wts["fc_w"].shape[0]
    fw["fc_w_pad"] = jnp.pad(wts["fc_w"], ((0, _CP - c_last), (0, _VP - V)))
    fw["fc_b_pad"] = jnp.pad(wts["fc_b"], ((0, 0), (0, _VP - V)))
    return fw


# ================================ forward pass ================================
def rvae_dilated_forward(params, fw, drop_prob, encoder_word_input,
                         decoder_word_input, eps, dropout_key=None):
    """Returns (logits [B,T,V], kld scalar, z [B,L], final_state=None)."""
    B, S = encoder_word_input.shape
    T = decoder_word_input.shape[1]
    V = params.word_vocab_size

    # ---- encoder path: ids -> fused(embed + BiGRU + mu/logvar + reparam + KLD) ----
    enc_ids = jnp.transpose(encoder_word_input).reshape(S * B, 1)      # time-major ids
    z, kld = bigru_latent(enc_ids, eps, fw)

    # ---- decoder path: ids -> fused(embed + concat z + im2col convs + fc) ----
    dec_ids = decoder_word_input[:, :, None]                           # [B, T, 1]
    drop_mask = None
    if drop_prob > 0.0:
        keep = jax.random.bernoulli(dropout_key, 1.0 - drop_prob,
                                    (B, T, params.word_embed_size))
        drop_mask = keep.astype(jnp.float32) / (1.0 - drop_prob)
    logits_full = fused_decoder(params, fw, dec_ids, z, drop_mask)     # [B, t_pad, 128]
    logits = logits_full[:, :T, :V]
    return logits, kld[0, 0], z, None                      # dilation decoder is stateless


# ============================ pure-JAX reference ==============================
def reference_forward(params, wts, enc_in, dec_in, eps):
    H = params.encoder_rnn_size
    emb = wts["word_embed"]
    enc_emb = jnp.take(emb, enc_in, axis=0)
    B, S, _ = enc_emb.shape

    def gru_cell(x_t, h, wih, whh, bih, bhh):
        gi = x_t @ wih + bih
        gh = h @ whh + bhh
        r = jax.nn.sigmoid(gi[:, :H] + gh[:, :H])
        zg = jax.nn.sigmoid(gi[:, H:2 * H] + gh[:, H:2 * H])
        n = jnp.tanh(gi[:, 2 * H:] + r * gh[:, 2 * H:])
        return (1.0 - zg) * n + zg * h

    hf = jnp.zeros((B, H), jnp.float32)
    hb = jnp.zeros((B, H), jnp.float32)
    for t in range(S):
        hf = gru_cell(enc_emb[:, t], hf, wts["enc_wih_f"], wts["enc_whh_f"],
                      wts["enc_bih_f"], wts["enc_bhh_f"])
        hb = gru_cell(enc_emb[:, S - 1 - t], hb, wts["enc_wih_b"], wts["enc_whh_b"],
                      wts["enc_bih_b"], wts["enc_bhh_b"])
    ctx = jnp.concatenate([hf, hb], axis=1)
    mu = ctx @ wts["w_mu"] + wts["b_mu"]
    logvar = ctx @ wts["w_lv"] + wts["b_lv"]
    z = eps * jnp.exp(0.5 * logvar) + mu
    kld = (-0.5 * jnp.sum(logvar - mu ** 2 - jnp.exp(logvar) + 1.0, axis=1)).mean()

    dec_emb = jnp.take(emb, dec_in, axis=0)
    T = dec_emb.shape[1]
    x = jnp.concatenate(
        [dec_emb, jnp.broadcast_to(z[:, None, :], (B, T, z.shape[-1]))], axis=2)
    for w, b, dil in zip(wts["conv_w"], wts["conv_b"], params.decoder_dilations):
        K = w.shape[0]
        pad = (K - 1) * dil
        xp = jnp.pad(x, ((0, 0), (pad, 0), (0, 0)))
        y = 0.0
        for k in range(K):
            y = y + jnp.einsum('btc,cd->btd', xp[:, k * dil:k * dil + T, :], w[k])
        x = jnp.maximum(y + b, 0.0)
    logits = jnp.einsum('btc,cv->btv', x, wts["fc_w"]) + wts["fc_b"]
    return logits, kld, z


# ==================================== main ====================================
if __name__ == "__main__":
    params = Params()
    key = jax.random.PRNGKey(0)
    k_w, k_enc, k_dec, k_eps = jax.random.split(key, 4)

    B, S = 2, 8                      # batch, encoder seq len
    T = 9                            # decoder seq len (max_seq_len + 1)

    wts = init_weights(params, k_w)
    fused = prepare_fused_weights(params, wts)

    encoder_word_input = jax.random.randint(k_enc, (B, S), 0,
                                            params.word_vocab_size, jnp.int32)
    decoder_word_input = jax.random.randint(k_dec, (B, T), 0,
                                            params.word_vocab_size, jnp.int32)
    eps = jax.random.normal(k_eps, (B, params.latent_variable_size), jnp.float32)

    fwd = jax.jit(lambda fw, e_in, d_in, e:
                  rvae_dilated_forward(params, fw, 0.0, e_in, d_in, e))
    logits, kld, z, final_state = fwd(fused, encoder_word_input,
                                      decoder_word_input, eps)
    jax.block_until_ready((logits, kld, z))

    # --- shape / sanity checks + pure-JAX reference on canonical weights ---
    assert logits.shape == (B, T, params.word_vocab_size), logits.shape
    assert z.shape == (B, params.latent_variable_size), z.shape
    assert final_state is None
    assert bool(jnp.all(jnp.isfinite(logits)))
    assert bool(jnp.isfinite(kld))

    ref_logits, ref_kld, ref_z = reference_forward(
        params, wts, encoder_word_input, decoder_word_input, eps)
    # Tolerance loosened (2e-2): kernel and reference both use default (bf16-on-MXU)
    # matmul precision now, but may round at slightly different points.
    assert bool(jnp.allclose(z, ref_z, atol=2e-2, rtol=2e-2)), \
        float(jnp.max(jnp.abs(z - ref_z)))
    assert bool(jnp.allclose(kld, ref_kld, atol=2e-2, rtol=2e-2)), \
        (float(kld), float(ref_kld))
    assert bool(jnp.allclose(logits, ref_logits, atol=2e-2, rtol=2e-2)), \
        float(jnp.max(jnp.abs(logits - ref_logits)))

    print("KERNEL_OK")
</pallas_src>

<mosaic_0001>
module attributes {stable_mosaic.version = 11 : i64} {
  func.func @fused_decoder_kernel(%arg0: i32, %arg1: memref<1x9x1xi32, #tpu.memory_space<vmem>>, %arg2: memref<1x1x16xf32, #tpu.memory_space<vmem>>, %arg3: memref<64x32xf32, #tpu.memory_space<vmem>>, %arg4: memref<384x128xf32, #tpu.memory_space<vmem>>, %arg5: memref<1x128xf32, #tpu.memory_space<vmem>>, %arg6: memref<384x128xf32, #tpu.memory_space<vmem>>, %arg7: memref<1x128xf32, #tpu.memory_space<vmem>>, %arg8: memref<128x128xf32, #tpu.memory_space<vmem>>, %arg9: memref<1x128xf32, #tpu.memory_space<vmem>>, %arg10: memref<1x16x128xf32, #tpu.memory_space<vmem>>) attributes {dimension_semantics = [#tpu.dimension_semantics<parallel>], iteration_bounds = array<i64: 2>, scalar_prefetch = 0 : i64, scratch_operands = 0 : i64, tpu.core_type = #tpu.core_type<tc>, window_params = [{transform_indices = @transform_0, window_bounds = array<i64: 1, 9, 1>}, {transform_indices = @transform_1, window_bounds = array<i64: 1, 1, 16>}, {pipeline_mode = #tpu.pipeline_mode<synchronous>, transform_indices = @transform_2, window_bounds = array<i64: 64, 32>}, {pipeline_mode = #tpu.pipeline_mode<synchronous>, transform_indices = @transform_3, window_bounds = array<i64: 384, 128>}, {pipeline_mode = #tpu.pipeline_mode<synchronous>, transform_indices = @transform_4, window_bounds = array<i64: 1, 128>}, {pipeline_mode = #tpu.pipeline_mode<synchronous>, transform_indices = @transform_5, window_bounds = array<i64: 384, 128>}, {pipeline_mode = #tpu.pipeline_mode<synchronous>, transform_indices = @transform_6, window_bounds = array<i64: 1, 128>}, {pipeline_mode = #tpu.pipeline_mode<synchronous>, transform_indices = @transform_7, window_bounds = array<i64: 128, 128>}, {pipeline_mode = #tpu.pipeline_mode<synchronous>, transform_indices = @transform_8, window_bounds = array<i64: 1, 128>}, {transform_indices = @transform_9, window_bounds = array<i64: 1, 16, 128>}]} {
    %0 = tpu.iota {dimensions = array<i32: 1>} : vector<9x64xi32>
    %c0 = arith.constant 0 : index
    %c0_0 = arith.constant 0 : index
    %c0_1 = arith.constant 0 : index
    %1 = vector.load %arg1[%c0, %c0_0, %c0_1] : memref<1x9x1xi32, #tpu.memory_space<vmem>>, vector<1x9x1xi32>
    %2 = vector.shape_cast %1 : vector<1x9x1xi32> to vector<9x1xi32>
    %3 = vector.broadcast %2 : vector<9x1xi32> to vector<9x64xi32>
    %4 = arith.cmpi eq, %3, %0 : vector<9x64xi32>
    %5 = arith.extui %4 : vector<9x64xi1> to vector<9x64xi32>
    %6 = arith.sitofp %5 : vector<9x64xi32> to vector<9x64xf32>
    %c0_2 = arith.constant 0 : index
    %c0_3 = arith.constant 0 : index
    %7 = vector.load %arg3[%c0_2, %c0_3] : memref<64x32xf32, #tpu.memory_space<vmem>>, vector<64x32xf32>
    %cst = arith.constant dense<0.000000e+00> : vector<9x32xf32>
    %8 = tpu.matmul %6, %7, %cst {dimension_numbers = #tpu.dot_dimension_numbers<[1], [0], [0], [1], [0, 0, 1, 1], [], []>} : vector<9x64xf32>, vector<64x32xf32>, vector<9x32xf32> -> vector<9x32xf32>
    %c0_4 = arith.constant 0 : index
    %c0_5 = arith.constant 0 : index
    %c0_6 = arith.constant 0 : index
    %9 = vector.load %arg2[%c0_4, %c0_5, %c0_6] : memref<1x1x16xf32, #tpu.memory_space<vmem>>, vector<1x1x16xf32>
    %10 = vector.shape_cast %9 : vector<1x1x16xf32> to vector<1x16xf32>
    %11 = vector.shape_cast %10 : vector<1x16xf32> to vector<1x16xf32>
    %12 = vector.broadcast %11 : vector<1x16xf32> to vector<9x16xf32>
    %cst_7 = arith.constant 0.000000e+00 : f32
    %13 = vector.broadcast %cst_7 : f32 to vector<9x80xf32>
    %14 = tpu.concatenate %8, %12, %13 in 1 : vector<9x32xf32>, vector<9x16xf32>, vector<9x80xf32> -> vector<9x128xf32>
    %cst_8 = arith.constant 0.000000e+00 : f32
    %15 = vector.broadcast %cst_8 : f32 to vector<7x128xf32>
    %16 = tpu.concatenate %14, %15 in 0 : vector<9x128xf32>, vector<7x128xf32> -> vector<16x128xf32>
    %cst_9 = arith.constant 0.000000e+00 : f32
    %17 = vector.broadcast %cst_9 : f32 to vector<2x128xf32>
    %18 = tpu.concatenate %17, %16 in 0 : vector<2x128xf32>, vector<16x128xf32> -> vector<18x128xf32>
    %19 = vector.extract_strided_slice %18 {offsets = [0, 0], sizes = [16, 128], strides = [1, 1]} : vector<18x128xf32> to vector<16x128xf32>
    %20 = vector.extract_strided_slice %18 {offsets = [1, 0], sizes = [16, 128], strides = [1, 1]} : vector<18x128xf32> to vector<16x128xf32>
    %21 = vector.extract_strided_slice %18 {offsets = [2, 0], sizes = [16, 128], strides = [1, 1]} : vector<18x128xf32> to vector<16x128xf32>
    %22 = tpu.concatenate %19, %20, %21 in 1 : vector<16x128xf32>, vector<16x128xf32>, vector<16x128xf32> -> vector<16x384xf32>
    %c0_10 = arith.constant 0 : index
    %c0_11 = arith.constant 0 : index
    %23 = vector.load %arg4[%c0_10, %c0_11] : memref<384x128xf32, #tpu.memory_space<vmem>>, vector<384x128xf32>
    %cst_12 = arith.constant dense<0.000000e+00> : vector<16x128xf32>
    %24 = tpu.matmul %22, %23, %cst_12 {dimension_numbers = #tpu.dot_dimension_numbers<[1], [0], [0], [1], [0, 0, 1, 1], [], []>} : vector<16x384xf32>, vector<384x128xf32>, vector<16x128xf32> -> vector<16x128xf32>
    %c0_13 = arith.constant 0 : index
    %c0_14 = arith.constant 0 : index
    %25 = vector.load %arg5[%c0_13, %c0_14] : memref<1x128xf32, #tpu.memory_space<vmem>>, vector<1x128xf32>
    %26 = vector.broadcast %25 : vector<1x128xf32> to vector<16x128xf32>
    %27 = arith.addf %24, %26 : vector<16x128xf32>
    %cst_15 = arith.constant 0.000000e+00 : f32
    %28 = vector.broadcast %cst_15 : f32 to vector<16x128xf32>
    %29 = arith.maximumf %27, %28 : vector<16x128xf32>
    %cst_16 = arith.constant 0.000000e+00 : f32
    %30 = vector.broadcast %cst_16 : f32 to vector<4x128xf32>
    %31 = tpu.concatenate %30, %29 in 0 : vector<4x128xf32>, vector<16x128xf32> -> vector<20x128xf32>
    %32 = vector.extract_strided_slice %31 {offsets = [0, 0], sizes = [16, 128], strides = [1, 1]} : vector<20x128xf32> to vector<16x128xf32>
    %33 = vector.extract_strided_slice %31 {offsets = [2, 0], sizes = [16, 128], strides = [1, 1]} : vector<20x128xf32> to vector<16x128xf32>
    %34 = vector.extract_strided_slice %31 {offsets = [4, 0], sizes = [16, 128], strides = [1, 1]} : vector<20x128xf32> to vector<16x128xf32>
    %35 = tpu.concatenate %32, %33, %34 in 1 : vector<16x128xf32>, vector<16x128xf32>, vector<16x128xf32> -> vector<16x384xf32>
    %c0_17 = arith.constant 0 : index
    %c0_18 = arith.constant 0 : index
    %36 = vector.load %arg6[%c0_17, %c0_18] : memref<384x128xf32, #tpu.memory_space<vmem>>, vector<384x128xf32>
    %cst_19 = arith.constant dense<0.000000e+00> : vector<16x128xf32>
    %37 = tpu.matmul %35, %36, %cst_19 {dimension_numbers = #tpu.dot_dimension_numbers<[1], [0], [0], [1], [0, 0, 1, 1], [], []>} : vector<16x384xf32>, vector<384x128xf32>, vector<16x128xf32> -> vector<16x128xf32>
    %c0_20 = arith.constant 0 : index
    %c0_21 = arith.constant 0 : index
    %38 = vector.load %arg7[%c0_20, %c0_21] : memref<1x128xf32, #tpu.memory_space<vmem>>, vector<1x128xf32>
    %39 = vector.broadcast %38 : vector<1x128xf32> to vector<16x128xf32>
    %40 = arith.addf %37, %39 : vector<16x128xf32>
    %cst_22 = arith.constant 0.000000e+00 : f32
    %41 = vector.broadcast %cst_22 : f32 to vector<16x128xf32>
    %42 = arith.maximumf %40, %41 : vector<16x128xf32>
    %c0_23 = arith.constant 0 : index
    %c0_24 = arith.constant 0 : index
    %43 = vector.load %arg8[%c0_23, %c0_24] : memref<128x128xf32, #tpu.memory_space<vmem>>, vector<128x128xf32>
    %cst_25 = arith.constant dense<0.000000e+00> : vector<16x128xf32>
    %44 = tpu.matmul %42, %43, %cst_25 {dimension_numbers = #tpu.dot_dimension_numbers<[1], [0], [0], [1], [0, 0, 1, 1], [], []>} : vector<16x128xf32>, vector<128x128xf32>, vector<16x128xf32> -> vector<16x128xf32>
    %c0_26 = arith.constant 0 : index
    %c0_27 = arith.constant 0 : index
    %45 = vector.load %arg9[%c0_26, %c0_27] : memref<1x128xf32, #tpu.memory_space<vmem>>, vector<1x128xf32>
    %46 = vector.broadcast %45 : vector<1x128xf32> to vector<16x128xf32>
    %47 = arith.addf %44, %46 : vector<16x128xf32>
    %c0_28 = arith.constant 0 : index
    %c0_29 = arith.constant 0 : index
    %c0_30 = arith.constant 0 : index
    %48 = vector.load %arg10[%c0_28, %c0_29, %c0_30] : memref<1x16x128xf32, #tpu.memory_space<vmem>>, vector<1x16x128xf32>
    %49 = vector.shape_cast %48 : vector<1x16x128xf32> to vector<16x128xf32>
    %50 = vector.shape_cast %47 : vector<16x128xf32> to vector<1x16x128xf32>
    tpu.vector_store %arg10[%c0_28, %c0_29, %c0_30], %50 {strides = array<i32>} : memref<1x16x128xf32, #tpu.memory_space<vmem>>, vector<1x16x128xf32>,
    return
  }
  func.func @transform_0(%arg0: i32) -> (i32, i32, i32) {
    %c0_i32 = arith.constant 0 : i32
    %c0_i32_0 = arith.constant 0 : i32
    %c0_i32_1 = arith.constant 0 : i32
    return %arg0, %c0_i32, %c0_i32_0 : i32, i32, i32
  }
  func.func @transform_1(%arg0: i32) -> (i32, i32, i32) {
    %c0_i32 = arith.constant 0 : i32
    %c0_i32_0 = arith.constant 0 : i32
    %c0_i32_1 = arith.constant 0 : i32
    return %arg0, %c0_i32, %c0_i32_0 : i32, i32, i32
  }
  func.func @transform_2(%arg0: i32) -> (i32, i32) {
    %c0_i32 = arith.constant 0 : i32
    %c0_i32_0 = arith.constant 0 : i32
    %c0_i32_1 = arith.constant 0 : i32
    return %c0_i32, %c0_i32_0 : i32, i32
  }
  func.func @transform_3(%arg0: i32) -> (i32, i32) {
    %c0_i32 = arith.constant 0 : i32
    %c0_i32_0 = arith.constant 0 : i32
    %c0_i32_1 = arith.constant 0 : i32
    return %c0_i32, %c0_i32_0 : i32, i32
  }
  func.func @transform_4(%arg0: i32) -> (i32, i32) {
    %c0_i32 = arith.constant 0 : i32
    %c0_i32_0 = arith.constant 0 : i32
    %c0_i32_1 = arith.constant 0 : i32
    return %c0_i32, %c0_i32_0 : i32, i32
  }
  func.func @transform_5(%arg0: i32) -> (i32, i32) {
    %c0_i32 = arith.constant 0 : i32
    %c0_i32_0 = arith.constant 0 : i32
    %c0_i32_1 = arith.constant 0 : i32
    return %c0_i32, %c0_i32_0 : i32, i32
  }
  func.func @transform_6(%arg0: i32) -> (i32, i32) {
    %c0_i32 = arith.constant 0 : i32
    %c0_i32_0 = arith.constant 0 : i32
    %c0_i32_1 = arith.constant 0 : i32
    return %c0_i32, %c0_i32_0 : i32, i32
  }
  func.func @transform_7(%arg0: i32) -> (i32, i32) {
    %c0_i32 = arith.constant 0 : i32
    %c0_i32_0 = arith.constant 0 : i32
    %c0_i32_1 = arith.constant 0 : i32
    return %c0_i32, %c0_i32_0 : i32, i32
  }
  func.func @transform_8(%arg0: i32) -> (i32, i32) {
    %c0_i32 = arith.constant 0 : i32
    %c0_i32_0 = arith.constant 0 : i32
    %c0_i32_1 = arith.constant 0 : i32
    return %c0_i32, %c0_i32_0 : i32, i32
  }
  func.func @transform_9(%arg0: i32) -> (i32, i32, i32) {
    %c0_i32 = arith.constant 0 : i32
    %c0_i32_0 = arith.constant 0 : i32
    %c0_i32_1 = arith.constant 0 : i32
    return %arg0, %c0_i32, %c0_i32_0 : i32, i32, i32
  }
}

module attributes {stable_mosaic.version = 11 : i64} {
  func.func @bigru_latent_kernel(%arg0: memref<16x1xi32, #tpu.memory_space<vmem>>, %arg1: memref<64x32xf32, #tpu.memory_space<vmem>>, %arg2: memref<32x192xf32, #tpu.memory_space<vmem>>, %arg3: memref<1x192xf32, #tpu.memory_space<vmem>>, %arg4: memref<64x192xf32, #tpu.memory_space<vmem>>, %arg5: memref<1x192xf32, #tpu.memory_space<vmem>>, %arg6: memref<64x16xf32, #tpu.memory_space<vmem>>, %arg7: memref<1x16xf32, #tpu.memory_space<vmem>>, %arg8: memref<64x16xf32, #tpu.memory_space<vmem>>, %arg9: memref<1x16xf32, #tpu.memory_space<vmem>>, %arg10: memref<2x16xf32, #tpu.memory_space<vmem>>, %arg11: memref<2x16xf32, #tpu.memory_space<vmem>>, %arg12: memref<1x1xf32, #tpu.memory_space<vmem>>) attributes {dimension_semantics = [], scalar_prefetch = 0 : i64, scratch_operands = 0 : i64, tpu.core_type = #tpu.core_type<tc>} {
    %0 = tpu.iota {dimensions = array<i32: 1>} : vector<16x64xi32>
    %c0 = arith.constant 0 : index
    %c0_0 = arith.constant 0 : index
    %1 = vector.load %arg0[%c0, %c0_0] : memref<16x1xi32, #tpu.memory_space<vmem>>, vector<16x1xi32>
    %2 = vector.broadcast %1 : vector<16x1xi32> to vector<16x64xi32>
    %3 = arith.cmpi eq, %2, %0 : vector<16x64xi32>
    %4 = arith.extui %3 : vector<16x64xi1> to vector<16x64xi32>
    %5 = arith.sitofp %4 : vector<16x64xi32> to vector<16x64xf32>
    %c0_1 = arith.constant 0 : index
    %c0_2 = arith.constant 0 : index
    %6 = vector.load %arg1[%c0_1, %c0_2] : memref<64x32xf32, #tpu.memory_space<vmem>>, vector<64x32xf32>
    %cst = arith.constant dense<0.000000e+00> : vector<16x32xf32>
    %7 = tpu.matmul %5, %6, %cst {dimension_numbers = #tpu.dot_dimension_numbers<[1], [0], [0], [1], [0, 0, 1, 1], [], []>} : vector<16x64xf32>, vector<64x32xf32>, vector<16x32xf32> -> vector<16x32xf32>
    %c0_3 = arith.constant 0 : index
    %c0_4 = arith.constant 0 : index
    %8 = vector.load %arg2[%c0_3, %c0_4] : memref<32x192xf32, #tpu.memory_space<vmem>>, vector<32x192xf32>
    %cst_5 = arith.constant dense<0.000000e+00> : vector<16x192xf32>
    %9 = tpu.matmul %7, %8, %cst_5 {dimension_numbers = #tpu.dot_dimension_numbers<[1], [0], [0], [1], [0, 0, 1, 1], [], []>} : vector<16x32xf32>, vector<32x192xf32>, vector<16x192xf32> -> vector<16x192xf32>
    %c0_6 = arith.constant 0 : index
    %c0_7 = arith.constant 0 : index
    %10 = vector.load %arg3[%c0_6, %c0_7] : memref<1x192xf32, #tpu.memory_space<vmem>>, vector<1x192xf32>
    %11 = vector.broadcast %10 : vector<1x192xf32> to vector<16x192xf32>
    %12 = arith.addf %9, %11 : vector<16x192xf32>
    %c0_8 = arith.constant 0 : index
    %c0_9 = arith.constant 0 : index
    %13 = vector.load %arg4[%c0_8, %c0_9] : memref<64x192xf32, #tpu.memory_space<vmem>>, vector<64x192xf32>
    %c0_10 = arith.constant 0 : index
    %c0_11 = arith.constant 0 : index
    %14 = vector.load %arg5[%c0_10, %c0_11] : memref<1x192xf32, #tpu.memory_space<vmem>>, vector<1x192xf32>
    %15 = tpu.iota {dimensions = array<i32: 1>} : vector<1x192xi32>
    %c32_i32 = arith.constant 32 : i32
    %16 = vector.broadcast %c32_i32 : i32 to vector<1x192xi32>
    %17 = arith.cmpi slt, %15, %16 : vector<1x192xi32>
    %c64_i32 = arith.constant 64 : i32
    %18 = vector.broadcast %c64_i32 : i32 to vector<1x192xi32>
    %19 = arith.cmpi sge, %15, %18 : vector<1x192xi32>
    %c96_i32 = arith.constant 96 : i32
    %20 = vector.broadcast %c96_i32 : i32 to vector<1x192xi32>
    %21 = arith.cmpi slt, %15, %20 : vector<1x192xi32>
    %22 = arith.andi %19, %21 : vector<1x192xi1>
    %23 = arith.ori %17, %22 : vector<1x192xi1>
    %c128_i32 = arith.constant 128 : i32
    %24 = vector.broadcast %c128_i32 : i32 to vector<1x192xi32>
    %25 = arith.cmpi sge, %15, %24 : vector<1x192xi32>
    %c160_i32 = arith.constant 160 : i32
    %26 = vector.broadcast %c160_i32 : i32 to vector<1x192xi32>
    %27 = arith.cmpi slt, %15, %26 : vector<1x192xi32>
    %28 = arith.andi %25, %27 : vector<1x192xi1>
    %29 = arith.ori %23, %28 : vector<1x192xi1>
    %cst_12 = arith.constant 0.000000e+00 : f32
    %30 = vector.broadcast %cst_12 : f32 to vector<2x64xf32>
    %31 = vector.extract_strided_slice %12 {offsets = [0, 0], sizes = [2, 192], strides = [1, 1]} : vector<16x192xf32> to vector<2x192xf32>
    %32 = vector.extract_strided_slice %12 {offsets = [14, 0], sizes = [2, 192], strides = [1, 1]} : vector<16x192xf32> to vector<2x192xf32>
    %33 = vector.shape_cast %29 : vector<1x192xi1> to vector<1x192xi1>
    %34 = vector.broadcast %33 : vector<1x192xi1> to vector<2x192xi1>
    %35 = arith.select %34, %31, %32 : vector<2x192xi1>, vector<2x192xf32>
    %cst_13 = arith.constant dense<0.000000e+00> : vector<2x192xf32>
    %36 = tpu.matmul %30, %13, %cst_13 {dimension_numbers = #tpu.dot_dimension_numbers<[1], [0], [0], [1], [0, 0, 1, 1], [], []>} : vector<2x64xf32>, vector<64x192xf32>, vector<2x192xf32> -> vector<2x192xf32>
    %37 = vector.broadcast %14 : vector<1x192xf32> to vector<2x192xf32>
    %38 = arith.addf %36, %37 : vector<2x192xf32>
    %39 = vector.extract_strided_slice %35 {offsets = [0, 0], sizes = [2, 64], strides = [1, 1]} : vector<2x192xf32> to vector<2x64xf32>
    %40 = vector.extract_strided_slice %38 {offsets = [0, 0], sizes = [2, 64], strides = [1, 1]} : vector<2x192xf32> to vector<2x64xf32>
    %41 = arith.addf %39, %40 : vector<2x64xf32>
    %42 = arith.negf %41 : vector<2x64xf32>
    %43 = math.exp %42 : vector<2x64xf32>
    %cst_14 = arith.constant 1.000000e+00 : f32
    %44 = vector.broadcast %cst_14 : f32 to vector<2x64xf32>
    %45 = arith.addf %44, %43 : vector<2x64xf32>
    %46 = arith.divf %44, %45 : vector<2x64xf32>
    %47 = vector.extract_strided_slice %35 {offsets = [0, 64], sizes = [2, 64], strides = [1, 1]} : vector<2x192xf32> to vector<2x64xf32>
    %48 = vector.extract_strided_slice %38 {offsets = [0, 64], sizes = [2, 64], strides = [1, 1]} : vector<2x192xf32> to vector<2x64xf32>
    %49 = arith.addf %47, %48 : vector<2x64xf32>
    %50 = arith.negf %49 : vector<2x64xf32>
    %51 = math.exp %50 : vector<2x64xf32>
    %cst_15 = arith.constant 1.000000e+00 : f32
    %52 = vector.broadcast %cst_15 : f32 to vector<2x64xf32>
    %53 = arith.addf %52, %51 : vector<2x64xf32>
    %54 = arith.divf %52, %53 : vector<2x64xf32>
    %55 = vector.extract_strided_slice %35 {offsets = [0, 128], sizes = [2, 64], strides = [1, 1]} : vector<2x192xf32> to vector<2x64xf32>
    %56 = vector.extract_strided_slice %38 {offsets = [0, 128], sizes = [2, 64], strides = [1, 1]} : vector<2x192xf32> to vector<2x64xf32>
    %57 = arith.mulf %46, %56 : vector<2x64xf32>
    %58 = arith.addf %55, %57 : vector<2x64xf32>
    %59 = math.tanh %58 : vector<2x64xf32>
    %cst_16 = arith.constant 1.000000e+00 : f32
    %60 = vector.broadcast %cst_16 : f32 to vector<2x64xf32>
    %61 = arith.subf %60, %54 : vector<2x64xf32>
    %62 = arith.mulf %61, %59 : vector<2x64xf32>
    %63 = arith.mulf %54, %30 : vector<2x64xf32>
    %64 = arith.addf %62, %63 : vector<2x64xf32>
    %65 = vector.extract_strided_slice %12 {offsets = [2, 0], sizes = [2, 192], strides = [1, 1]} : vector<16x192xf32> to vector<2x192xf32>
    %66 = vector.extract_strided_slice %12 {offsets = [12, 0], sizes = [2, 192], strides = [1, 1]} : vector<16x192xf32> to vector<2x192xf32>
    %67 = vector.shape_cast %29 : vector<1x192xi1> to vector<1x192xi1>
    %68 = vector.broadcast %67 : vector<1x192xi1> to vector<2x192xi1>
    %69 = arith.select %68, %65, %66 : vector<2x192xi1>, vector<2x192xf32>
    %cst_17 = arith.constant dense<0.000000e+00> : vector<2x192xf32>
    %70 = tpu.matmul %64, %13, %cst_17 {dimension_numbers = #tpu.dot_dimension_numbers<[1], [0], [0], [1], [0, 0, 1, 1], [], []>} : vector<2x64xf32>, vector<64x192xf32>, vector<2x192xf32> -> vector<2x192xf32>
    %71 = vector.broadcast %14 : vector<1x192xf32> to vector<2x192xf32>
    %72 = arith.addf %70, %71 : vector<2x192xf32>
    %73 = vector.extract_strided_slice %69 {offsets = [0, 0], sizes = [2, 64], strides = [1, 1]} : vector<2x192xf32> to vector<2x64xf32>
    %74 = vector.extract_strided_slice %72 {offsets = [0, 0], sizes = [2, 64], strides = [1, 1]} : vector<2x192xf32> to vector<2x64xf32>
    %75 = arith.addf %73, %74 : vector<2x64xf32>
    %76 = arith.negf %75 : vector<2x64xf32>
    %77 = math.exp %76 : vector<2x64xf32>
    %cst_18 = arith.constant 1.000000e+00 : f32
    %78 = vector.broadcast %cst_18 : f32 to vector<2x64xf32>
    %79 = arith.addf %78, %77 : vector<2x64xf32>
    %80 = arith.divf %78, %79 : vector<2x64xf32>
    %81 = vector.extract_strided_slice %69 {offsets = [0, 64], sizes = [2, 64], strides = [1, 1]} : vector<2x192xf32> to vector<2x64xf32>
    %82 = vector.extract_strided_slice %72 {offsets = [0, 64], sizes = [2, 64], strides = [1, 1]} : vector<2x192xf32> to vector<2x64xf32>
    %83 = arith.addf %81, %82 : vector<2x64xf32>
    %84 = arith.negf %83 : vector<2x64xf32>
    %85 = math.exp %84 : vector<2x64xf32>
    %cst_19 = arith.constant 1.000000e+00 : f32
    %86 = vector.broadcast %cst_19 : f32 to vector<2x64xf32>
    %87 = arith.addf %86, %85 : vector<2x64xf32>
    %88 = arith.divf %86, %87 : vector<2x64xf32>
    %89 = vector.extract_strided_slice %69 {offsets = [0, 128], sizes = [2, 64], strides = [1, 1]} : vector<2x192xf32> to vector<2x64xf32>
    %90 = vector.extract_strided_slice %72 {offsets = [0, 128], sizes = [2, 64], strides = [1, 1]} : vector<2x192xf32> to vector<2x64xf32>
    %91 = arith.mulf %80, %90 : vector<2x64xf32>
    %92 = arith.addf %89, %91 : vector<2x64xf32>
    %93 = math.tanh %92 : vector<2x64xf32>
    %cst_20 = arith.constant 1.000000e+00 : f32
    %94 = vector.broadcast %cst_20 : f32 to vector<2x64xf32>
    %95 = arith.subf %94, %88 : vector<2x64xf32>
    %96 = arith.mulf %95, %93 : vector<2x64xf32>
    %97 = arith.mulf %88, %64 : vector<2x64xf32>
    %98 = arith.addf %96, %97 : vector<2x64xf32>
    %99 = vector.extract_strided_slice %12 {offsets = [4, 0], sizes = [2, 192], strides = [1, 1]} : vector<16x192xf32> to vector<2x192xf32>
    %100 = vector.extract_strided_slice %12 {offsets = [10, 0], sizes = [2, 192], strides = [1, 1]} : vector<16x192xf32> to vector<2x192xf32>
    %101 = vector.shape_cast %29 : vector<1x192xi1> to vector<1x192xi1>
    %102 = vector.broadcast %101 : vector<1x192xi1> to vector<2x192xi1>
    %103 = arith.select %102, %99, %100 : vector<2x192xi1>, vector<2x192xf32>
    %cst_21 = arith.constant dense<0.000000e+00> : vector<2x192xf32>
    %104 = tpu.matmul %98, %13, %cst_21 {dimension_numbers = #tpu.dot_dimension_numbers<[1], [0], [0], [1], [0, 0, 1, 1], [], []>} : vector<2x64xf32>, vector<64x192xf32>, vector<2x192xf32> -> vector<2x192xf32>
    %105 = vector.broadcast %14 : vector<1x192xf32> to vector<2x192xf32>
    %106 = arith.addf %104, %105 : vector<2x192xf32>
    %107 = vector.extract_strided_slice %103 {offsets = [0, 0], sizes = [2, 64], strides = [1, 1]} : vector<2x192xf32> to vector<2x64xf32>
    %108 = vector.extract_strided_slice %106 {offsets = [0, 0], sizes = [2, 64], strides = [1, 1]} : vector<2x192xf32> to vector<2x64xf32>
    %109 = arith.addf %107, %108 : vector<2x64xf32>
    %110 = arith.negf %109 : vector<2x64xf32>
    %111 = math.exp %110 : vector<2x64xf32>
    %cst_22 = arith.constant 1.000000e+00 : f32
    %112 = vector.broadcast %cst_22 : f32 to vector<2x64xf32>
    %113 = arith.addf %112, %111 : vector<2x64xf32>
    %114 = arith.divf %112, %113 : vector<2x64xf32>
    %115 = vector.extract_strided_slice %103 {offsets = [0, 64], sizes = [2, 64], strides = [1, 1]} : vector<2x192xf32> to vector<2x64xf32>
    %116 = vector.extract_strided_slice %106 {offsets = [0, 64], sizes = [2, 64], strides = [1, 1]} : vector<2x192xf32> to vector<2x64xf32>
    %117 = arith.addf %115, %116 : vector<2x64xf32>
    %118 = arith.negf %117 : vector<2x64xf32>
    %119 = math.exp %118 : vector<2x64xf32>
    %cst_23 = arith.constant 1.000000e+00 : f32
    %120 = vector.broadcast %cst_23 : f32 to vector<2x64xf32>
    %121 = arith.addf %120, %119 : vector<2x64xf32>
    %122 = arith.divf %120, %121 : vector<2x64xf32>
    %123 = vector.extract_strided_slice %103 {offsets = [0, 128], sizes = [2, 64], strides = [1, 1]} : vector<2x192xf32> to vector<2x64xf32>
    %124 = vector.extract_strided_slice %106 {offsets = [0, 128], sizes = [2, 64], strides = [1, 1]} : vector<2x192xf32> to vector<2x64xf32>
    %125 = arith.mulf %114, %124 : vector<2x64xf32>
    %126 = arith.addf %123, %125 : vector<2x64xf32>
    %127 = math.tanh %126 : vector<2x64xf32>
    %cst_24 = arith.constant 1.000000e+00 : f32
    %128 = vector.broadcast %cst_24 : f32 to vector<2x64xf32>
    %129 = arith.subf %128, %122 : vector<2x64xf32>
    %130 = arith.mulf %129, %127 : vector<2x64xf32>
    %131 = arith.mulf %122, %98 : vector<2x64xf32>
    %132 = arith.addf %130, %131 : vector<2x64xf32>
    %133 = vector.extract_strided_slice %12 {offsets = [6, 0], sizes = [2, 192], strides = [1, 1]} : vector<16x192xf32> to vector<2x192xf32>
    %134 = vector.extract_strided_slice %12 {offsets = [8, 0], sizes = [2, 192], strides = [1, 1]} : vector<16x192xf32> to vector<2x192xf32>
    %135 = vector.shape_cast %29 : vector<1x192xi1> to vector<1x192xi1>
    %136 = vector.broadcast %135 : vector<1x192xi1> to vector<2x192xi1>
    %137 = arith.select %136, %133, %134 : vector<2x192xi1>, vector<2x192xf32>
    %cst_25 = arith.constant dense<0.000000e+00> : vector<2x192xf32>
    %138 = tpu.matmul %132, %13, %cst_25 {dimension_numbers = #tpu.dot_dimension_numbers<[1], [0], [0], [1], [0, 0, 1, 1], [], []>} : vector<2x64xf32>, vector<64x192xf32>, vector<2x192xf32> -> vector<2x192xf32>
    %139 = vector.broadcast %14 : vector<1x192xf32> to vector<2x192xf32>
    %140 = arith.addf %138, %139 : vector<2x192xf32>
    %141 = vector.extract_strided_slice %137 {offsets = [0, 0], sizes = [2, 64], strides = [1, 1]} : vector<2x192xf32> to vector<2x64xf32>
    %142 = vector.extract_strided_slice %140 {offsets = [0, 0], sizes = [2, 64], strides = [1, 1]} : vector<2x192xf32> to vector<2x64xf32>
    %143 = arith.addf %141, %142 : vector<2x64xf32>
    %144 = arith.negf %143 : vector<2x64xf32>
    %145 = math.exp %144 : vector<2x64xf32>
    %cst_26 = arith.constant 1.000000e+00 : f32
    %146 = vector.broadcast %cst_26 : f32 to vector<2x64xf32>
    %147 = arith.addf %146, %145 : vector<2x64xf32>
    %148 = arith.divf %146, %147 : vector<2x64xf32>
    %149 = vector.extract_strided_slice %137 {offsets = [0, 64], sizes = [2, 64], strides = [1, 1]} : vector<2x192xf32> to vector<2x64xf32>
    %150 = vector.extract_strided_slice %140 {offsets = [0, 64], sizes = [2, 64], strides = [1, 1]} : vector<2x192xf32> to vector<2x64xf32>
    %151 = arith.addf %149, %150 : vector<2x64xf32>
    %152 = arith.negf %151 : vector<2x64xf32>
    %153 = math.exp %152 : vector<2x64xf32>
    %cst_27 = arith.constant 1.000000e+00 : f32
    %154 = vector.broadcast %cst_27 : f32 to vector<2x64xf32>
    %155 = arith.addf %154, %153 : vector<2x64xf32>
    %156 = arith.divf %154, %155 : vector<2x64xf32>
    %157 = vector.extract_strided_slice %137 {offsets = [0, 128], sizes = [2, 64], strides = [1, 1]} : vector<2x192xf32> to vector<2x64xf32>
    %158 = vector.extract_strided_slice %140 {offsets = [0, 128], sizes = [2, 64], strides = [1, 1]} : vector<2x192xf32> to vector<2x64xf32>
    %159 = arith.mulf %148, %158 : vector<2x64xf32>
    %160 = arith.addf %157, %159 : vector<2x64xf32>
    %161 = math.tanh %160 : vector<2x64xf32>
    %cst_28 = arith.constant 1.000000e+00 : f32
    %162 = vector.broadcast %cst_28 : f32 to vector<2x64xf32>
    %163 = arith.subf %162, %156 : vector<2x64xf32>
    %164 = arith.mulf %163, %161 : vector<2x64xf32>
    %165 = arith.mulf %156, %132 : vector<2x64xf32>
    %166 = arith.addf %164, %165 : vector<2x64xf32>
    %167 = vector.extract_strided_slice %12 {offsets = [8, 0], sizes = [2, 192], strides = [1, 1]} : vector<16x192xf32> to vector<2x192xf32>
    %168 = vector.extract_strided_slice %12 {offsets = [6, 0], sizes = [2, 192], strides = [1, 1]} : vector<16x192xf32> to vector<2x192xf32>
    %169 = vector.shape_cast %29 : vector<1x192xi1> to vector<1x192xi1>
    %170 = vector.broadcast %169 : vector<1x192xi1> to vector<2x192xi1>
    %171 = arith.select %170, %167, %168 : vector<2x192xi1>, vector<2x192xf32>
    %cst_29 = arith.constant dense<0.000000e+00> : vector<2x192xf32>
    %172 = tpu.matmul %166, %13, %cst_29 {dimension_numbers = #tpu.dot_dimension_numbers<[1], [0], [0], [1], [0, 0, 1, 1], [], []>} : vector<2x64xf32>, vector<64x192xf32>, vector<2x192xf32> -> vector<2x192xf32>
    %173 = vector.broadcast %14 : vector<1x192xf32> to vector<2x192xf32>
    %174 = arith.addf %172, %173 : vector<2x192xf32>
    %175 = vector.extract_strided_slice %171 {offsets = [0, 0], sizes = [2, 64], strides = [1, 1]} : vector<2x192xf32> to vector<2x64xf32>
    %176 = vector.extract_strided_slice %174 {offsets = [0, 0], sizes = [2, 64], strides = [1, 1]} : vector<2x192xf32> to vector<2x64xf32>
    %177 = arith.addf %175, %176 : vector<2x64xf32>
    %178 = arith.negf %177 : vector<2x64xf32>
    %179 = math.exp %178 : vector<2x64xf32>
    %cst_30 = arith.constant 1.000000e+00 : f32
    %180 = vector.broadcast %cst_30 : f32 to vector<2x64xf32>
    %181 = arith.addf %180, %179 : vector<2x64xf32>
    %182 = arith.divf %180, %181 : vector<2x64xf32>
    %183 = vector.extract_strided_slice %171 {offsets = [0, 64], sizes = [2, 64], strides = [1, 1]} : vector<2x192xf32> to vector<2x64xf32>
    %184 = vector.extract_strided_slice %174 {offsets = [0, 64], sizes = [2, 64], strides = [1, 1]} : vector<2x192xf32> to vector<2x64xf32>
    %185 = arith.addf %183, %184 : vector<2x64xf32>
    %186 = arith.negf %185 : vector<2x64xf32>
    %187 = math.exp %186 : vector<2x64xf32>
    %cst_31 = arith.constant 1.000000e+00 : f32
    %188 = vector.broadcast %cst_31 : f32 to vector<2x64xf32>
    %189 = arith.addf %188, %187 : vector<2x64xf32>
    %190 = arith.divf %188, %189 : vector<2x64xf32>
    %191 = vector.extract_strided_slice %171 {offsets = [0, 128], sizes = [2, 64], strides = [1, 1]} : vector<2x192xf32> to vector<2x64xf32>
    %192 = vector.extract_strided_slice %174 {offsets = [0, 128], sizes = [2, 64], strides = [1, 1]} : vector<2x192xf32> to vector<2x64xf32>
    %193 = arith.mulf %182, %192 : vector<2x64xf32>
    %194 = arith.addf %191, %193 : vector<2x64xf32>
    %195 = math.tanh %194 : vector<2x64xf32>
    %cst_32 = arith.constant 1.000000e+00 : f32
    %196 = vector.broadcast %cst_32 : f32 to vector<2x64xf32>
    %197 = arith.subf %196, %190 : vector<2x64xf32>
    %198 = arith.mulf %197, %195 : vector<2x64xf32>
    %199 = arith.mulf %190, %166 : vector<2x64xf32>
    %200 = arith.addf %198, %199 : vector<2x64xf32>
    %201 = vector.extract_strided_slice %12 {offsets = [10, 0], sizes = [2, 192], strides = [1, 1]} : vector<16x192xf32> to vector<2x192xf32>
    %202 = vector.extract_strided_slice %12 {offsets = [4, 0], sizes = [2, 192], strides = [1, 1]} : vector<16x192xf32> to vector<2x192xf32>
    %203 = vector.shape_cast %29 : vector<1x192xi1> to vector<1x192xi1>
    %204 = vector.broadcast %203 : vector<1x192xi1> to vector<2x192xi1>
    %205 = arith.select %204, %201, %202 : vector<2x192xi1>, vector<2x192xf32>
    %cst_33 = arith.constant dense<0.000000e+00> : vector<2x192xf32>
    %206 = tpu.matmul %200, %13, %cst_33 {dimension_numbers = #tpu.dot_dimension_numbers<[1], [0], [0], [1], [0, 0, 1, 1], [], []>} : vector<2x64xf32>, vector<64x192xf32>, vector<2x192xf32> -> vector<2x192xf32>
    %207 = vector.broadcast %14 : vector<1x192xf32> to vector<2x192xf32>
    %208 = arith.addf %206, %207 : vector<2x192xf32>
    %209 = vector.extract_strided_slice %205 {offsets = [0, 0], sizes = [2, 64], strides = [1, 1]} : vector<2x192xf32> to vector<2x64xf32>
    %210 = vector.extract_strided_slice %208 {offsets = [0, 0], sizes = [2, 64], strides = [1, 1]} : vector<2x192xf32> to vector<2x64xf32>
    %211 = arith.addf %209, %210 : vector<2x64xf32>
    %212 = arith.negf %211 : vector<2x64xf32>
    %213 = math.exp %212 : vector<2x64xf32>
    %cst_34 = arith.constant 1.000000e+00 : f32
    %214 = vector.broadcast %cst_34 : f32 to vector<2x64xf32>
    %215 = arith.addf %214, %213 : vector<2x64xf32>
    %216 = arith.divf %214, %215 : vector<2x64xf32>
    %217 = vector.extract_strided_slice %205 {offsets = [0, 64], sizes = [2, 64], strides = [1, 1]} : vector<2x192xf32> to vector<2x64xf32>
    %218 = vector.extract_strided_slice %208 {offsets = [0, 64], sizes = [2, 64], strides = [1, 1]} : vector<2x192xf32> to vector<2x64xf32>
    %219 = arith.addf %217, %218 : vector<2x64xf32>
    %220 = arith.negf %219 : vector<2x64xf32>
    %221 = math.exp %220 : vector<2x64xf32>
    %cst_35 = arith.constant 1.000000e+00 : f32
    %222 = vector.broadcast %cst_35 : f32 to vector<2x64xf32>
    %223 = arith.addf %222, %221 : vector<2x64xf32>
    %224 = arith.divf %222, %223 : vector<2x64xf32>
    %225 = vector.extract_strided_slice %205 {offsets = [0, 128], sizes = [2, 64], strides = [1, 1]} : vector<2x192xf32> to vector<2x64xf32>
    %226 = vector.extract_strided_slice %208 {offsets = [0, 128], sizes = [2, 64], strides = [1, 1]} : vector<2x192xf32> to vector<2x64xf32>
    %227 = arith.mulf %216, %226 : vector<2x64xf32>
    %228 = arith.addf %225, %227 : vector<2x64xf32>
    %229 = math.tanh %228 : vector<2x64xf32>
    %cst_36 = arith.constant 1.000000e+00 : f32
    %230 = vector.broadcast %cst_36 : f32 to vector<2x64xf32>
    %231 = arith.subf %230, %224 : vector<2x64xf32>
    %232 = arith.mulf %231, %229 : vector<2x64xf32>
    %233 = arith.mulf %224, %200 : vector<2x64xf32>
    %234 = arith.addf %232, %233 : vector<2x64xf32>
    %235 = vector.extract_strided_slice %12 {offsets = [12, 0], sizes = [2, 192], strides = [1, 1]} : vector<16x192xf32> to vector<2x192xf32>
    %236 = vector.extract_strided_slice %12 {offsets = [2, 0], sizes = [2, 192], strides = [1, 1]} : vector<16x192xf32> to vector<2x192xf32>
    %237 = vector.shape_cast %29 : vector<1x192xi1> to vector<1x192xi1>
    %238 = vector.broadcast %237 : vector<1x192xi1> to vector<2x192xi1>
    %239 = arith.select %238, %235, %236 : vector<2x192xi1>, vector<2x192xf32>
    %cst_37 = arith.constant dense<0.000000e+00> : vector<2x192xf32>
    %240 = tpu.matmul %234, %13, %cst_37 {dimension_numbers = #tpu.dot_dimension_numbers<[1], [0], [0], [1], [0, 0, 1, 1], [], []>} : vector<2x64xf32>, vector<64x192xf32>, vector<2x192xf32> -> vector<2x192xf32>
    %241 = vector.broadcast %14 : vector<1x192xf32> to vector<2x192xf32>
    %242 = arith.addf %240, %241 : vector<2x192xf32>
    %243 = vector.extract_strided_slice %239 {offsets = [0, 0], sizes = [2, 64], strides = [1, 1]} : vector<2x192xf32> to vector<2x64xf32>
    %244 = vector.extract_strided_slice %242 {offsets = [0, 0], sizes = [2, 64], strides = [1, 1]} : vector<2x192xf32> to vector<2x64xf32>
    %245 = arith.addf %243, %244 : vector<2x64xf32>
    %246 = arith.negf %245 : vector<2x64xf32>
    %247 = math.exp %246 : vector<2x64xf32>
    %cst_38 = arith.constant 1.000000e+00 : f32
    %248 = vector.broadcast %cst_38 : f32 to vector<2x64xf32>
    %249 = arith.addf %248, %247 : vector<2x64xf32>
    %250 = arith.divf %248, %249 : vector<2x64xf32>
    %251 = vector.extract_strided_slice %239 {offsets = [0, 64], sizes = [2, 64], strides = [1, 1]} : vector<2x192xf32> to vector<2x64xf32>
    %252 = vector.extract_strided_slice %242 {offsets = [0, 64], sizes = [2, 64], strides = [1, 1]} : vector<2x192xf32> to vector<2x64xf32>
    %253 = arith.addf %251, %252 : vector<2x64xf32>
    %254 = arith.negf %253 : vector<2x64xf32>
    %255 = math.exp %254 : vector<2x64xf32>
    %cst_39 = arith.constant 1.000000e+00 : f32
    %256 = vector.broadcast %cst_39 : f32 to vector<2x64xf32>
    %257 = arith.addf %256, %255 : vector<2x64xf32>
    %258 = arith.divf %256, %257 : vector<2x64xf32>
    %259 = vector.extract_strided_slice %239 {offsets = [0, 128], sizes = [2, 64], strides = [1, 1]} : vector<2x192xf32> to vector<2x64xf32>
    %260 = vector.extract_strided_slice %242 {offsets = [0, 128], sizes = [2, 64], strides = [1, 1]} : vector<2x192xf32> to vector<2x64xf32>
    %261 = arith.mulf %250, %260 : vector<2x64xf32>
    %262 = arith.addf %259, %261 : vector<2x64xf32>
    %263 = math.tanh %262 : vector<2x64xf32>
    %cst_40 = arith.constant 1.000000e+00 : f32
    %264 = vector.broadcast %cst_40 : f32 to vector<2x64xf32>
    %265 = arith.subf %264, %258 : vector<2x64xf32>
    %266 = arith.mulf %265, %263 : vector<2x64xf32>
    %267 = arith.mulf %258, %234 : vector<2x64xf32>
    %268 = arith.addf %266, %267 : vector<2x64xf32>
    %269 = vector.extract_strided_slice %12 {offsets = [14, 0], sizes = [2, 192], strides = [1, 1]} : vector<16x192xf32> to vector<2x192xf32>
    %270 = vector.extract_strided_slice %12 {offsets = [0, 0], sizes = [2, 192], strides = [1, 1]} : vector<16x192xf32> to vector<2x192xf32>
    %271 = vector.shape_cast %29 : vector<1x192xi1> to vector<1x192xi1>
    %272 = vector.broadcast %271 : vector<1x192xi1> to vector<2x192xi1>
    %273 = arith.select %272, %269, %270 : vector<2x192xi1>, vector<2x192xf32>
    %cst_41 = arith.constant dense<0.000000e+00> : vector<2x192xf32>
    %274 = tpu.matmul %268, %13, %cst_41 {dimension_numbers = #tpu.dot_dimension_numbers<[1], [0], [0], [1], [0, 0, 1, 1], [], []>} : vector<2x64xf32>, vector<64x192xf32>, vector<2x192xf32> -> vector<2x192xf32>
    %275 = vector.broadcast %14 : vector<1x192xf32> to vector<2x192xf32>
    %276 = arith.addf %274, %275 : vector<2x192xf32>
    %277 = vector.extract_strided_slice %273 {offsets = [0, 0], sizes = [2, 64], strides = [1, 1]} : vector<2x192xf32> to vector<2x64xf32>
    %278 = vector.extract_strided_slice %276 {offsets = [0, 0], sizes = [2, 64], strides = [1, 1]} : vector<2x192xf32> to vector<2x64xf32>
    %279 = arith.addf %277, %278 : vector<2x64xf32>
    %280 = arith.negf %279 : vector<2x64xf32>
    %281 = math.exp %280 : vector<2x64xf32>
    %cst_42 = arith.constant 1.000000e+00 : f32
    %282 = vector.broadcast %cst_42 : f32 to vector<2x64xf32>
    %283 = arith.addf %282, %281 : vector<2x64xf32>
    %284 = arith.divf %282, %283 : vector<2x64xf32>
    %285 = vector.extract_strided_slice %273 {offsets = [0, 64], sizes = [2, 64], strides = [1, 1]} : vector<2x192xf32> to vector<2x64xf32>
    %286 = vector.extract_strided_slice %276 {offsets = [0, 64], sizes = [2, 64], strides = [1, 1]} : vector<2x192xf32> to vector<2x64xf32>
    %287 = arith.addf %285, %286 : vector<2x64xf32>
    %288 = arith.negf %287 : vector<2x64xf32>
    %289 = math.exp %288 : vector<2x64xf32>
    %cst_43 = arith.constant 1.000000e+00 : f32
    %290 = vector.broadcast %cst_43 : f32 to vector<2x64xf32>
    %291 = arith.addf %290, %289 : vector<2x64xf32>
    %292 = arith.divf %290, %291 : vector<2x64xf32>
    %293 = vector.extract_strided_slice %273 {offsets = [0, 128], sizes = [2, 64], strides = [1, 1]} : vector<2x192xf32> to vector<2x64xf32>
    %294 = vector.extract_strided_slice %276 {offsets = [0, 128], sizes = [2, 64], strides = [1, 1]} : vector<2x192xf32> to vector<2x64xf32>
    %295 = arith.mulf %284, %294 : vector<2x64xf32>
    %296 = arith.addf %293, %295 : vector<2x64xf32>
    %297 = math.tanh %296 : vector<2x64xf32>
    %cst_44 = arith.constant 1.000000e+00 : f32
    %298 = vector.broadcast %cst_44 : f32 to vector<2x64xf32>
    %299 = arith.subf %298, %292 : vector<2x64xf32>
    %300 = arith.mulf %299, %297 : vector<2x64xf32>
    %301 = arith.mulf %292, %268 : vector<2x64xf32>
    %302 = arith.addf %300, %301 : vector<2x64xf32>
    %c0_45 = arith.constant 0 : index
    %c0_46 = arith.constant 0 : index
    %303 = vector.load %arg6[%c0_45, %c0_46] : memref<64x16xf32, #tpu.memory_space<vmem>>, vector<64x16xf32>
    %cst_47 = arith.constant dense<0.000000e+00> : vector<2x16xf32>
    %304 = tpu.matmul %302, %303, %cst_47 {dimension_numbers = #tpu.dot_dimension_numbers<[1], [0], [0], [1], [0, 0, 1, 1], [], []>} : vector<2x64xf32>, vector<64x16xf32>, vector<2x16xf32> -> vector<2x16xf32>
    %c0_48 = arith.constant 0 : index
    %c0_49 = arith.constant 0 : index
    %305 = vector.load %arg7[%c0_48, %c0_49] : memref<1x16xf32, #tpu.memory_space<vmem>>, vector<1x16xf32>
    %306 = vector.broadcast %305 : vector<1x16xf32> to vector<2x16xf32>
    %307 = arith.addf %304, %306 : vector<2x16xf32>
    %c0_50 = arith.constant 0 : index
    %c0_51 = arith.constant 0 : index
    %308 = vector.load %arg8[%c0_50, %c0_51] : memref<64x16xf32, #tpu.memory_space<vmem>>, vector<64x16xf32>
    %cst_52 = arith.constant dense<0.000000e+00> : vector<2x16xf32>
    %309 = tpu.matmul %302, %308, %cst_52 {dimension_numbers = #tpu.dot_dimension_numbers<[1], [0], [0], [1], [0, 0, 1, 1], [], []>} : vector<2x64xf32>, vector<64x16xf32>, vector<2x16xf32> -> vector<2x16xf32>
    %c0_53 = arith.constant 0 : index
    %c0_54 = arith.constant 0 : index
    %310 = vector.load %arg9[%c0_53, %c0_54] : memref<1x16xf32, #tpu.memory_space<vmem>>, vector<1x16xf32>
    %311 = vector.broadcast %310 : vector<1x16xf32> to vector<2x16xf32>
    %312 = arith.addf %309, %311 : vector<2x16xf32>
    %cst_55 = arith.constant 5.000000e-01 : f32
    %313 = vector.broadcast %cst_55 : f32 to vector<2x16xf32>
    %314 = arith.mulf %313, %312 : vector<2x16xf32>
    %315 = math.exp %314 : vector<2x16xf32>
    %c0_56 = arith.constant 0 : index
    %c0_57 = arith.constant 0 : index
    %316 = vector.load %arg10[%c0_56, %c0_57] : memref<2x16xf32, #tpu.memory_space<vmem>>, vector<2x16xf32>
    %317 = arith.mulf %316, %315 : vector<2x16xf32>
    %318 = arith.addf %317, %307 : vector<2x16xf32>
    %c0_58 = arith.constant 0 : index
    %c0_59 = arith.constant 0 : index
    %319 = vector.load %arg11[%c0_58, %c0_59] : memref<2x16xf32, #tpu.memory_space<vmem>>, vector<2x16xf32>
    tpu.vector_store %arg11[%c0_58, %c0_59], %318 {strides = array<i32>} : memref<2x16xf32, #tpu.memory_space<vmem>>, vector<2x16xf32>,
    %320 = arith.mulf %307, %307 : vector<2x16xf32>
    %321 = arith.subf %312, %320 : vector<2x16xf32>
    %322 = math.exp %312 : vector<2x16xf32>
    %323 = arith.subf %321, %322 : vector<2x16xf32>
    %cst_60 = arith.constant 1.000000e+00 : f32
    %324 = vector.broadcast %cst_60 : f32 to vector<2x16xf32>
    %325 = arith.addf %323, %324 : vector<2x16xf32>
    %cst_61 = arith.constant dense<0.000000e+00> : vector<2xf32>
    %326 = vector.multi_reduction <add>, %325, %cst_61 [1] : vector<2x16xf32> to vector<2xf32>
    %327 = vector.shape_cast %326 : vector<2xf32> to vector<2x1xf32>
    %cst_62 = arith.constant -5.000000e-01 : f32
    %328 = vector.broadcast %cst_62 : f32 to vector<2x1xf32>
    %329 = arith.mulf %328, %327 : vector<2x1xf32>
    %cst_63 = arith.constant 0.000000e+00 : f32
    %330 = vector.broadcast %cst_63 : f32 to vector<1x1xf32>
    %331 = vector.shape_cast %329 : vector<2x1xf32> to vector<1x2x1xf32>
    %cst_64 = arith.constant dense<0.000000e+00> : vector<1xf32>
    %332 = vector.multi_reduction <add>, %331, %cst_64 [1, 2] : vector<1x2x1xf32> to vector<1xf32>
    %333 = vector.shape_cast %332 : vector<1xf32> to vector<1x1x1xf32>
    %334 = vector.extract %333[0, 0, 0] : f32 from vector<1x1x1xf32>
    %cst_65 = arith.constant 5.000000e-01 : f32
    %335 = arith.mulf %334, %cst_65 : f32
    %336 = vector.broadcast %335 : f32 to vector<1x1xf32>
    %337 = arith.addf %330, %336 : vector<1x1xf32>
    %c0_66 = arith.constant 0 : index
    %c0_67 = arith.constant 0 : index
    %338 = vector.load %arg12[%c0_66, %c0_67] : memref<1x1xf32, #tpu.memory_space<vmem>>, vector<1x1xf32>
    tpu.vector_store %arg12[%c0_66, %c0_67], %337 {strides = array<i32>} : memref<1x1xf32, #tpu.memory_space<vmem>>, vector<1x1xf32>,
    return
  }
}

</mosaic_0001>

<bundles_post_ra>
// kernel: _lambda_.3
= control target key start
LH: loop header
LB: loop body
LE: loop exit
PB: predicated region body
PF: predicated region fallthrough
CT: control target
= control target key end

     0   :  { %14 = vsyncpa [#allocation3], 0  ;;  %s1243_s0 = inlined_call_operand.vmem [shape: s32[2,9,1], index: 0, kind: input, shape index: {}]   ;;  %s1244_s1 = inlined_call_operand.vmem [shape: f32[2,1,16], index: 1, kind: input, shape index: {}]   ;;  %s1245_s2 = inlined_call_operand.vmem [shape: f32[64,32], index: 2, kind: input, shape index: {}]   ;;  %s1246_s3 = inlined_call_operand.hbm [shape: f32[384,128], index: 3, kind: input, shape index: {}]   ;;  %s1247_s4 = inlined_call_operand.vmem [shape: f32[1,128], index: 4, kind: input, shape index: {}]   ;;  %s1248_s5 = inlined_call_operand.hbm [shape: f32[384,128], index: 5, kind: input, shape index: {}]   ;;  %s1249_s6 = inlined_call_operand.vmem [shape: f32[1,128], index: 6, kind: input, shape index: {}]   ;;  %s1250_s7 = inlined_call_operand.hbm [shape: f32[128,128], index: 7, kind: input, shape index: {}]   ;;  %s1251_s8 = inlined_call_operand.vmem [shape: f32[1,128], index: 8, kind: input, shape index: {}]   ;;  %s1252_s9 = inlined_call_operand.vmem [shape: f32[2,16,128], index: 9, kind: output, shape index: {}]  }
   0x1   :  { %15 = vsyncpa [#allocation5], 0  ;;  %s1141_s30 = smov 0  }
   0x2 LB: > { %s1147_s10 = sadd.s32 4294967295, %s1081_s30   ;;  %p903_p0 = scmp.ge.s32.totalorder %s1081_s30, 1  ;;  %s1081_s30 = sphi %s1141_s30, %s21_s30  }
   0x3   : > { %p251_p1 = scmp.lt.s32.totalorder %s1081_s30, 3  ;;  %p950_p2 = scmp.eq.s32.totalorder %s1147_s10, 0 }
   0x4   : > { %s282_s13 = sshll.u32 %s1248_s5, 4  ;;  %s265_s17 = sshll.u32 %s1246_s3, 4  ;;  %s283_s13 = int_to_ptr.hbm [resolvable:$true] %s282_s13  ;;  %s266_s17 = int_to_ptr.hbm [resolvable:$true] %s265_s17 }
   0x5   : > { %p1155_p3 = pnand %p903_p0, %p251_p1  ;;  %s1083_s18 = smov [#allocation4]  }
   0x6   : > { %s284_s19 = sshll.u32 %s1083_s18, 4  ;;  %s1084_s20 = smov [#allocation2]   ;;  %s285_s19 = int_to_ptr.vmem [resolvable:$true] %s284_s19 }
   0x7   : > { %p940_p4 = pneg %p1155_p3  ;;  %s267_s21 = sshll.u32 %s1084_s20, 4  ;;  %s268_s21 = int_to_ptr.vmem [resolvable:$true] %s267_s21 }
   0x8   : > { %s299_s24 = sshll.u32 %s1250_s7, 4  ;;  %s1085_s25 = smov 128   ;;  %s300_s24 = int_to_ptr.hbm [resolvable:$true] %s299_s24 }
   0x9   : > { %p941_p5 = pnand %p950_p2, %p940_p4  ;;  %s1086_s26 = smov 8  }
   0xa   : > { %s1087_s27 = smov [#allocation6]   ;;  %334 = sbr.rel (%p1155_p3) target bundleno = 715 (0x2cb), region = 56 }
   0xb   : > { %946 = dma.hbm_to_vmem [thread:$0]  (!%p941_p5), %s283_s13, 6144, %s285_s19, [#allocation5], %s1085_s25, %s1085_s25, %s1086_s26  }
   0xc   : > { %943 = dma.hbm_to_vmem [thread:$0]  (!%p941_p5), %s266_s17, 6144, %s268_s21, [#allocation3], %s1085_s25, %s1085_s25, %s1086_s26  }
   0xd   : > { %s301_s28 = sshll.u32 %s1087_s27, 4  ;;  %s302_s28 = int_to_ptr.vmem [resolvable:$true] %s301_s28 }
   0xe   : > { %949 = dma.hbm_to_vmem [thread:$0]  (!%p941_p5), %s300_s24, 2048, %s302_s28, [#allocation5], %s1085_s25, %s1085_s25, %s1086_s26  }
   0xf   : > { %1072 = dma.done.wait (%p950_p2), [#allocation3], 6144  }
  0x10   : > { %1074 = vsyncadd (%p950_p2), [#allocation3], 4294961152 }
  0x11   : > { %1076 = dma.done.wait (%p950_p2), [#allocation5], 8192  }
  0x12   : > { %1078 = vsyncadd (%p950_p2), [#allocation5], 4294959104  ;;  %p384_p6 = scmp.lt.s32.totalorder %s1147_s10, 1  ;;  %v1088_v0 = vmov 0   ;;  %v420_v2 = vld [vmem:[%s1245_s2 + $0x38] sm:$0xff]  ;;  %v419_v3 = vld [vmem:[%s1245_s2 + $0x30] sm:$0xff]  ;;  %v397_v34 = vlaneseq }
  0x13   : > { %972 = vset.pattern.permute.xlu0 %v1088_v0  ;;  %436 = vmatpush.msra.mxu0 %v420_v2  ;;  %v418_v4 = vld [vmem:[%s1245_s2 + $0x28] sm:$0xff]  ;;  %v417_v5 = vld [vmem:[%s1245_s2 + $0x20] sm:$0xff]  ;;  %v416_v7 = vld [vmem:[%s1245_s2 + $0x18] sm:$0xff]  ;;  %vm421_vm0 = vcmask 523264   ;;  %v1090_v42 = vmov 0.0   ;;  %vm457_vm3 = vcmask 261120  }
  0x14   : > { %s1255_s10 = smov (!%p384_p6, %s1147_s10), 1  ;;  %v415_v8 = vld [vmem:[%s1245_s2 + $0x10] sm:$0xff]  ;;  %v414_v9 = vld [vmem:[%s1245_s2 + $0x8] sm:$0xff]  ;;  %v413_v10 = vld [vmem:[%s1245_s2] sm:$0xff]  ;;  %v398_v37 = vand.u32 127, %v397_v34  ;;  %vm460_vm4 = vcmask 392192  }
  0x15   : > { %s926_s29 = sshll.u32 %s1255_s10, 4  ;;  %s391_s22 = scalar_lea.vmem %s1244_s1, %s1255_s10  ;;  %437 = vmatpush.msra.mxu0 %v419_v3  ;;  %v506_v12 = vld [vmem:[#allocation2 + $0x78] sm:$0xff]  ;;  %v505_v13 = vld [vmem:[#allocation2 + $0x70] sm:$0xff]  ;;  %v504_v14 = vld [vmem:[#allocation2 + $0x68] sm:$0xff]  ;;  %vm467_vm5 = vcmask 1041408   ;;  %vm463_vm7 = vcmask 1040384  }
  0x16   : > { %s388_s13 = scalar_lea.vmem %s1243_s0, %s926_s29  ;;  %v973_v11 = vld [vmem:[%s391_s22] ss:$0 sm:$0xff]  ;;  %543 = vmatpush.msra.mxu1 %v506_v12  ;;  %v522_v15 = vld [vmem:[#allocation2 + $0xf8] sm:$0xff]  ;;  %v521_v17 = vld [vmem:[#allocation2 + $0xf0] sm:$0xff]  ;;  %vm475_vm8 = vcmask 1046528   ;;  %vm483_vm9 = vcmask 1045504   ;;  %s396_s24 = scalar_lea.vmem %s1252_s9, %s926_s29 }
  0x17   : > { %v399_v1 = vld [vmem:[%s388_s13] sm:$0xff]  ;;  %438 = vmatpush.msra.mxu0 %v418_v4  ;;  %v400_v6 = vld [vmem:[%s388_s13 + $0x8] sm:$0x1]  ;;  %s1089_s13 = smov 32   ;;  %566 = vmatpush.msra.mxu2 %v522_v15  ;;  %v538_v16 = vld [vmem:[#allocation2 + $0x178] sm:$0xff]  ;;  %vm616_vm10 = vcmask 1043456  }
  0x18   : > { %402 = vperm.xlu0 %972, %v399_v1   ;;  %454 = vrot.lane.b32.xlu1 %v973_v11, %s1089_s13  ;;  %v503_v18 = vld [vmem:[#allocation2 + $0x60] sm:$0xff]  ;;  %v537_v19 = vld [vmem:[#allocation2 + $0x170] sm:$0xff]  ;;  %v520_v20 = vld [vmem:[#allocation2 + $0xe8] sm:$0xff] }
  0x19   : > { %439 = vmatpush.msra.mxu0 %v417_v5  ;;  %544 = vmatpush.msra.mxu1 %v505_v13  ;;  %v536_v21 = vld [vmem:[#allocation2 + $0x168] sm:$0xff]  ;;  %v502_v22 = vld [vmem:[#allocation2 + $0x58] sm:$0xff]  ;;  %v519_v23 = vld [vmem:[#allocation2 + $0xe0] sm:$0xff] }
  0x1a   : > { %589 = vmatpush.msra.mxu3 %v538_v16  ;;  %567 = vmatpush.msra.mxu2 %v521_v17  ;;  %v535_v24 = vld [vmem:[#allocation2 + $0x160] sm:$0xff]  ;;  %v501_v25 = vld [vmem:[#allocation2 + $0x50] sm:$0xff]  ;;  %v518_v26 = vld [vmem:[#allocation2 + $0xd8] sm:$0xff] }
  0x1b   : > { %440 = vmatpush.msra.mxu0 %v416_v7  ;;  %545 = vmatpush.msra.mxu1 %v504_v14  ;;  %v534_v27 = vld [vmem:[#allocation2 + $0x158] sm:$0xff]  ;;  %v500_v28 = vld [vmem:[#allocation2 + $0x48] sm:$0xff]  ;;  %v517_v29 = vld [vmem:[#allocation2 + $0xd0] sm:$0xff] }
  0x1c   : > { %590 = vmatpush.msra.mxu3 %v537_v19  ;;  %568 = vmatpush.msra.mxu2 %v520_v20  ;;  %v533_v30 = vld [vmem:[#allocation2 + $0x150] sm:$0xff]  ;;  %v499_v31 = vld [vmem:[#allocation2 + $0x40] sm:$0xff]  ;;  %v516_v32 = vld [vmem:[#allocation2 + $0xc8] sm:$0xff] }
  0x1d   : > { %441 = vmatpush.msra.mxu0 %v415_v8  ;;  %546 = vmatpush.msra.mxu1 %v503_v18  ;;  %v532_v33 = vld [vmem:[#allocation2 + $0x148] sm:$0xff]  ;;  %v498_v35 = vld [vmem:[#allocation2 + $0x38] sm:$0xff]  ;;  %v497_v36 = vld [vmem:[#allocation2 + $0x30] sm:$0xff] }
  0x1e   : > { %591 = vmatpush.msra.mxu3 %v536_v21  ;;  %569 = vmatpush.msra.mxu2 %v519_v23  ;;  %v496_v38 = vld [vmem:[#allocation2 + $0x28] sm:$0xff]  ;;  %v495_v39 = vld [vmem:[#allocation2 + $0x20] sm:$0xff]  ;;  %v494_v41 = vld [vmem:[#allocation2 + $0x18] sm:$0xff] }
  0x1f   : > { %442 = vmatpush.msra.mxu0 %v414_v9  ;;  %547 = vmatpush.msra.mxu1 %v502_v22  ;;  %v493_v44 = vld [vmem:[#allocation2 + $0x10] sm:$0xff]  ;;  %v515_v47 = vld [vmem:[#allocation2 + $0xc0] sm:$0xff]  ;;  %v492_v49 = vld [vmem:[#allocation2 + $0x8] sm:$0xff] }
  0x20   : > { %405 = vperm.xlu0 %972, %v400_v6   ;;  %592 = vmatpush.msra.mxu3 %v535_v24  ;;  %v531_v48 = vld [vmem:[#allocation2 + $0x140] sm:$0xff]  ;;  %v514_v50 = vld [vmem:[#allocation2 + $0xb8] sm:$0xff]  ;;  %v513_v53 = vld [vmem:[#allocation2 + $0xb0] sm:$0xff] }
  0x21   : > { %443 = vmatpush.msra.mxu0 %v413_v10  ;;  %548 = vmatpush.msra.mxu1 %v501_v25  ;;  %v530_v51 = vld [vmem:[#allocation2 + $0x138] sm:$0xff]  ;;  %v491_v52 = vld [vmem:[#allocation2] sm:$0xff]  ;;  %v529_v54 = vld [vmem:[#allocation2 + $0x130] sm:$0xff] }
  0x22   : > { %570 = vmatpush.msra.mxu2 %v518_v26  ;;  %593 = vmatpush.msra.mxu3 %v534_v27  ;;  %v512_v55 = vld [vmem:[#allocation2 + $0xa8] sm:$0xff]  ;;  %v511_v57 = vld [vmem:[#allocation2 + $0xa0] sm:$0xff]  ;;  %v510_v59 = vld [vmem:[#allocation2 + $0x98] sm:$0xff] }
  0x23   : > { %549 = vmatpush.msra.mxu1 %v500_v28  ;;  %v528_v56 = vld [vmem:[#allocation2 + $0x128] sm:$0xff]  ;;  %v527_v58 = vld [vmem:[#allocation2 + $0x120] sm:$0xff]  ;;  %v526_v60 = vld [vmem:[#allocation2 + $0x118] sm:$0xff] }
  0x24   : > { %571 = vmatpush.msra.mxu2 %v517_v29  ;;  %594 = vmatpush.msra.mxu3 %v533_v30  ;;  %v509_v61 = vld [vmem:[#allocation2 + $0x90] sm:$0xff]  ;;  %v508_v63 = vld [vmem:[#allocation2 + $0x88] sm:$0xff]  ;;  %v507_v1 = vld [vmem:[#allocation2 + $0x80] sm:$0xff] }
  0x25   : > { %550 = vmatpush.msra.mxu1 %v499_v31  ;;  %v525_v62 = vld [vmem:[#allocation2 + $0x110] sm:$0xff]  ;;  %v524_v0 = vld [vmem:[#allocation2 + $0x108] sm:$0xff]  ;;  %v523_v2 = vld [vmem:[#allocation2 + $0x100] sm:$0xff] }
  0x26   : > { %572 = vmatpush.msra.mxu2 %v516_v32  ;;  %595 = vmatpush.msra.mxu3 %v532_v33  ;;  %v653_v3 = vld [vmem:[#allocation4 + $0x78] sm:$0xff]  ;;  %v652_v4 = vld [vmem:[#allocation4 + $0x70] sm:$0xff]  ;;  %vm920_vm6 = vmneg %vm467_vm5 }
  0x27   : > { %551 = vmatpush.msra.mxu1 %v498_v35  ;;  %690 = vmatpush.msrb.mxu0 %v653_v3  ;;  %v651_v27 = vld [vmem:[#allocation4 + $0x68] sm:$0xff]  ;;  %v650_v28 = vld [vmem:[#allocation4 + $0x60] sm:$0xff]  ;;  %v649_v29 = vld [vmem:[#allocation4 + $0x58] sm:$0xff] }
  0x28   : > { %573 = vmatpush.msra.mxu2 %v515_v47  ;;  %596 = vmatpush.msra.mxu3 %v531_v48  ;;  %v669_v30 = vld [vmem:[#allocation4 + $0xf8] sm:$0xff]  ;;  %v648_v32 = vld [vmem:[#allocation4 + $0x50] sm:$0xff]  ;;  %v647_v33 = vld [vmem:[#allocation4 + $0x48] sm:$0xff] }
  0x29   : > { %552 = vmatpush.msra.mxu1 %v497_v36  ;;  %691 = vmatpush.msrb.mxu0 %v652_v4  ;;  %v685_v31 = vld [vmem:[#allocation4 + $0x178] sm:$0xff]  ;;  %v646_v34 = vld [vmem:[#allocation4 + $0x40] sm:$0xff]  ;;  %v668_v35 = vld [vmem:[#allocation4 + $0xf0] sm:$0xff] }
  0x2a   : > { %574 = vmatpush.msra.mxu2 %v514_v50  ;;  %597 = vmatpush.msra.mxu3 %v530_v51  ;;  %v684_v36 = vld [vmem:[#allocation4 + $0x170] sm:$0xff]  ;;  %v663_v50 = vld [vmem:[#allocation4 + $0xc8] sm:$0xff]  ;;  %vm922_vm11 = vmneg %vm616_vm10 }
  0x2b   : > { %553 = vmatpush.msra.mxu1 %v496_v38  ;;  %692 = vmatpush.msrb.mxu0 %v651_v27  ;;  %v667_v38 = vld [vmem:[#allocation4 + $0xe8] sm:$0xff]  ;;  %v664_v47 = vld [vmem:[#allocation4 + $0xd0] sm:$0xff] }
  0x2c   : > { %575 = vmatpush.msra.mxu2 %v513_v53  ;;  %598 = vmatpush.msra.mxu3 %v529_v54  ;;  %v680_v48 = vld [vmem:[#allocation4 + $0x150] sm:$0xff]  ;;  %v679_v51 = vld [vmem:[#allocation4 + $0x148] sm:$0xff]  ;;  %v662_v53 = vld [vmem:[#allocation4 + $0xc0] sm:$0xff] }
  0x2d   : > { %554 = vmatpush.msra.mxu1 %v495_v39  ;;  %693 = vmatpush.msrb.mxu0 %v650_v28  ;;  %v683_v39 = vld [vmem:[#allocation4 + $0x168] sm:$0xff]  ;;  %v678_v54 = vld [vmem:[#allocation4 + $0x140] sm:$0xff]  ;;  %v656_v3 = vld [vmem:[#allocation4 + $0x90] sm:$0xff] }
  0x2e   : > { %576 = vmatpush.msra.mxu2 %v512_v55  ;;  %599 = vmatpush.msra.mxu3 %v528_v56  ;;  %v639_v55 = vld [vmem:[#allocation4 + $0x8] sm:$0xff]  ;;  %v661_v56 = vld [vmem:[#allocation4 + $0xb8] sm:$0xff]  ;;  %v672_v4 = vld [vmem:[#allocation4 + $0x110] sm:$0xff] }
  0x2f   : > { %555 = vmatpush.msra.mxu1 %v494_v41  ;;  %694 = vmatpush.msrb.mxu0 %v649_v29  ;;  %v666_v41 = vld [vmem:[#allocation4 + $0xe0] sm:$0xff] }
  0x30   : > { %577 = vmatpush.msra.mxu2 %v511_v57  ;;  %600 = vmatpush.msra.mxu3 %v527_v58  ;;  %v677_v57 = vld [vmem:[#allocation4 + $0x138] sm:$0xff]  ;;  %v638_v58 = vld [vmem:[#allocation4] sm:$0xff] }
  0x31   : > { %556 = vmatpush.msra.mxu1 %v493_v44  ;;  %695 = vmatpush.msrb.mxu0 %v648_v32  ;;  %v665_v44 = vld [vmem:[#allocation4 + $0xd8] sm:$0xff] }
  0x32   : > { %578 = vmatpush.msra.mxu2 %v510_v59  ;;  %601 = vmatpush.msra.mxu3 %v526_v60  ;;  %v660_v59 = vld [vmem:[#allocation4 + $0xb0] sm:$0xff] }
  0x33   : > { %557 = vmatpush.msra.mxu1 %v492_v49  ;;  %696 = vmatpush.msrb.mxu0 %v647_v33  ;;  %v641_v49 = vld [vmem:[#allocation4 + $0x18] sm:$0xff]  ;;  %v676_v60 = vld [vmem:[#allocation4 + $0x130] sm:$0xff] }
  0x34   : > { %579 = vmatpush.msra.mxu2 %v509_v61  ;;  %602 = vmatpush.msra.mxu3 %v525_v62  ;;  %v659_v61 = vld [vmem:[#allocation4 + $0xa8] sm:$0xff] }
  0x35   : > { %558 = vmatpush.msra.mxu1 %v491_v52  ;;  %697 = vmatpush.msrb.mxu0 %v646_v34  ;;  %v640_v52 = vld [vmem:[#allocation4 + $0x10] sm:$0xff]  ;;  %v675_v62 = vld [vmem:[#allocation4 + $0x128] sm:$0xff] }
  0x36   : > { %580 = vmatpush.msra.mxu2 %v508_v63  ;;  %603 = vmatpush.msra.mxu3 %v524_v0  ;;  %v658_v63 = vld [vmem:[#allocation4 + $0xa0] sm:$0xff] }
  0x37   : > { %713 = vmatpush.msrb.mxu1 %v669_v30  ;;  %v674_v0 = vld [vmem:[#allocation4 + $0x120] sm:$0xff] }
  0x38   : > { %581 = vmatpush.msra.mxu2 %v507_v1  ;;  %604 = vmatpush.msra.mxu3 %v523_v2  ;;  %v657_v1 = vld [vmem:[#allocation4 + $0x98] sm:$0xff] }
  0x39   : > { %714 = vmatpush.msrb.mxu1 %v668_v35  ;;  %v673_v2 = vld [vmem:[#allocation4 + $0x118] sm:$0xff] }
  0x3a   : > { %736 = vmatpush.msrb.mxu2 %v685_v31 }
  0x3b   : > { %715 = vmatpush.msrb.mxu1 %v667_v38 }
  0x3c   : > { %737 = vmatpush.msrb.mxu2 %v684_v36 }
  0x3d   : > { %716 = vmatpush.msrb.mxu1 %v666_v41 }
  0x3e   : > { %738 = vmatpush.msrb.mxu2 %v683_v39 }
  0x3f   : > { %717 = vmatpush.msrb.mxu1 %v665_v44  ;;  %v770_v44 = vld [vmem:[#allocation6 + $0x48] sm:$0xff] }
  0x41   : > { %718 = vmatpush.msrb.mxu1 %v664_v47  ;;  %v767_v47 = vld [vmem:[#allocation6 + $0x30] sm:$0xff] }
  0x43   : > { %719 = vmatpush.msrb.mxu1 %v663_v50  ;;  %v764_v50 = vld [vmem:[#allocation6 + $0x18] sm:$0xff] }
  0x45   : > { %720 = vmatpush.msrb.mxu1 %v662_v53  ;;  %v761_v53 = vld [vmem:[#allocation6] sm:$0xff] }
  0x47   : > { %721 = vmatpush.msrb.mxu1 %v661_v56 }
  0x49   : > { %722 = vmatpush.msrb.mxu1 %v660_v59 }
  0x4b   : > { %723 = vmatpush.msrb.mxu1 %v659_v61 }
  0x4d   : > { %724 = vmatpush.msrb.mxu1 %v658_v63 }
  0x4f   : > { %725 = vmatpush.msrb.mxu1 %v657_v1 }
  0x51   : > { %726 = vmatpush.msrb.mxu1 %v656_v3 }
  0x8a   : > { %v403_v40 = vpop.permute.xlu0 %402  ;;  %v455_v5 = vpop.permute.xlu1 %454 }
  0x8b   : > { %vm407_vm1 = vcmp.eq.s32.totalorder %v403_v40, %v398_v37  ;;  %v644_v40 = vld [vmem:[#allocation4 + $0x30] sm:$0xff] }
  0x8c   : > { %v916_v43 = vsel %vm407_vm1, 1.0, %v1090_v42 }
  0x8d   : > { %918 = vmatmul.msk.f32.vlgmr.msra.gmra.mxu0 %vm421_vm0, %v916_v43  ;;  %v643_v43 = vld [vmem:[#allocation4 + $0x28] sm:$0xff] }
  0x92   : > { %v406_v45 = vpop.permute.xlu0 %405 }
  0x93   : > { %vm408_vm2 = vcmp.eq.s32.totalorder %v406_v45, %v398_v37  ;;  %v645_v37 = vld [vmem:[#allocation4 + $0x38] sm:$0xff] }
  0x94   : > { %v917_v46 = vsel %vm408_vm2, 1.0, %v1090_v42  ;;  %698 = vmatpush.msrb.mxu0 %v645_v37  ;;  %v682_v42 = vld [vmem:[#allocation4 + $0x160] sm:$0xff]  ;;  %v681_v45 = vld [vmem:[#allocation4 + $0x158] sm:$0xff] }
  0x95   : > { %919 = vmatmul.msk.f32.gmra.mxu0 %vm421_vm0, %v917_v46  ;;  %739 = vmatpush.msrb.mxu2 %v682_v42  ;;  %v642_v46 = vld [vmem:[#allocation4 + $0x20] sm:$0xff]  ;;  %v772_v42 = vld [vmem:[#allocation6 + $0x58] sm:$0xff] }
  0x96   : > { %699 = vmatpush.msrb.mxu0 %v644_v40 }
  0x97   : > { %740 = vmatpush.msrb.mxu2 %v681_v45  ;;  %v769_v45 = vld [vmem:[#allocation6 + $0x40] sm:$0xff] }
  0x98   : > { %700 = vmatpush.msrb.mxu0 %v643_v43  ;;  %v771_v43 = vld [vmem:[#allocation6 + $0x50] sm:$0xff] }
  0x99   : > { %741 = vmatpush.msrb.mxu2 %v680_v48  ;;  %v766_v48 = vld [vmem:[#allocation6 + $0x28] sm:$0xff] }
  0x9a   : > { %701 = vmatpush.msrb.mxu0 %v642_v46  ;;  %v768_v46 = vld [vmem:[#allocation6 + $0x38] sm:$0xff] }
  0x9b   : > { %742 = vmatpush.msrb.mxu2 %v679_v51  ;;  %v763_v51 = vld [vmem:[#allocation6 + $0x10] sm:$0xff] }
  0x9c   : > { %702 = vmatpush.msrb.mxu0 %v641_v49  ;;  %v765_v49 = vld [vmem:[#allocation6 + $0x20] sm:$0xff] }
  0x9d   : > { %743 = vmatpush.msrb.mxu2 %v678_v54 }
  0x9e   : > { %703 = vmatpush.msrb.mxu0 %v640_v52  ;;  %v762_v52 = vld [vmem:[#allocation6 + $0x8] sm:$0xff] }
  0x9f   : > { %744 = vmatpush.msrb.mxu2 %v677_v57 }
  0xa0   : > { %704 = vmatpush.msrb.mxu0 %v639_v55  ;;  %v975_v55 = vld [vmem:[%s1249_s6] ss:$0 sm:$0xff] }
  0xa1   : > { %745 = vmatpush.msrb.mxu2 %v676_v60 }
  0xa2   : > { %705 = vmatpush.msrb.mxu0 %v638_v58 }
  0xa3   : > { %746 = vmatpush.msrb.mxu2 %v675_v62 }
  0xa5   : > { %747 = vmatpush.msrb.mxu2 %v674_v0 }
  0xa7   : > { %748 = vmatpush.msrb.mxu2 %v673_v2 }
  0xa9   : > { %749 = vmatpush.msrb.mxu2 %v672_v4 }
 0x10a   : > { %v445_v6 = vpop.f32.mrf.mxu0 }
 0x10b   : > { %v458_v7 = vsel %vm457_vm3, %v445_v6, %v455_v5  ;;  %v671_v6 = vld [vmem:[#allocation4 + $0x108] sm:$0xff] }
 0x10c   : > { %v461_v8 = vsel %vm460_vm4, %v458_v7, 0.0  ;;  %v654_v7 = vld [vmem:[#allocation4 + $0x80] sm:$0xff]  ;;  %750 = vmatpush.msrb.mxu2 %v671_v6 }
 0x10d   : > { %v468_v9 = vrot.slane %v461_v8, 6  ;;  %v670_v8 = vld [vmem:[#allocation4 + $0x100] sm:$0xff] }
 0x10e   : > { %751 = vmatpush.msrb.mxu2 %v670_v8 }
 0x10f   : > { %921 = vmatmul.msk.f32.vlgmr.msra.gmra.mxu1 %vm920_vm6, %v468_v9  ;;  %v473_v15 = vsel %vm467_vm5, 0.0, %v468_v9 }
 0x110   : > { %v476_v19 = vrot.slane %v473_v15, 1  ;;  %v484_v20 = vrot.slane %v473_v15, 2 }
 0x112   : > { %v448_v10 = vpop.f32.mrf.mxu0 }
 0x113   : > { %v459_v11 = vsel %vm457_vm3, %v448_v10, %v455_v5  ;;  %v655_v5 = vld [vmem:[#allocation4 + $0x88] sm:$0xff] }
 0x114   : > { %v462_v12 = vsel %vm460_vm4, %v459_v11, 0.0  ;;  %727 = vmatpush.msrb.mxu1 %v655_v5  ;;  %v776_v11 = vld [vmem:[#allocation6 + $0x78] sm:$0xff]  ;;  %v976_v5 = vld [vmem:[%s1251_s8] ss:$0 sm:$0xff] }
 0x115   : > { %v464_v13 = vsel %vm463_vm7, %v462_v12, 0.0  ;;  %v775_v12 = vld [vmem:[#allocation6 + $0x70] sm:$0xff]  ;;  %781 = vmatpush.msrb.mxu3 %v776_v11 }
 0x116   : > { %v469_v14 = vrot.slane %v464_v13, 6  ;;  %728 = vmatpush.msrb.mxu1 %v654_v7 }
 0x117   : > { %782 = vmatpush.msrb.mxu3 %v775_v12 }
 0x118   : > { %v470_v16 = vsel %vm467_vm5, %v468_v9, %v469_v14  ;;  %v479_v23 = vrot.slane %v469_v14, 1  ;;  %v487_v24 = vrot.slane %v469_v14, 2  ;;  %v974_v9 = vld [vmem:[%s1247_s4] ss:$0 sm:$0xff]  ;;  %v774_v14 = vld [vmem:[#allocation6 + $0x68] sm:$0xff] }
 0x119   : > { %v477_v17 = vrot.slane %v470_v16, 1  ;;  %v485_v18 = vrot.slane %v470_v16, 2  ;;  %562 = vmatmul.f32.gmra.mxu1 %v470_v16  ;;  %783 = vmatpush.msrb.mxu3 %v774_v14 }
 0x11b   : > { %v478_v21 = vsel %vm475_vm8, %v476_v19, %v477_v17  ;;  %v486_v22 = vsel %vm483_vm9, %v484_v20, %v485_v18  ;;  %v480_v25 = vsel %vm475_vm8, %v477_v17, %v479_v23  ;;  %v488_v26 = vsel %vm483_vm9, %v485_v18, %v487_v24  ;;  %v773_v18 = vld [vmem:[#allocation6 + $0x60] sm:$0xff] }
 0x11c   : > { %582 = vmatmul.f32.vlgmr.msra.gmra.mxu2 %v478_v21  ;;  %605 = vmatmul.f32.vlgmr.msra.gmra.mxu3 %v486_v22 }
 0x11d   : > { %784 = vmatpush.msrb.mxu3 %v773_v18 }
 0x11f   : > { %785 = vmatpush.msrb.mxu3 %v772_v42 }
 0x121   : > { %786 = vmatpush.msrb.mxu3 %v771_v43 }
 0x123   : > { %787 = vmatpush.msrb.mxu3 %v770_v44 }
 0x124   : > { %585 = vmatmul.f32.gmra.mxu2 %v480_v25  ;;  %608 = vmatmul.f32.gmra.mxu3 %v488_v26 }
 0x125   : > { %788 = vmatpush.msrb.mxu3 %v769_v45 }
 0x127   : > { %789 = vmatpush.msrb.mxu3 %v768_v46 }
 0x129   : > { %790 = vmatpush.msrb.mxu3 %v767_v47 }
 0x12b   : > { %791 = vmatpush.msrb.mxu3 %v766_v48 }
 0x12d   : > { %792 = vmatpush.msrb.mxu3 %v765_v49 }
 0x12f   : > { %793 = vmatpush.msrb.mxu3 %v764_v50 }
 0x131   : > { %794 = vmatpush.msrb.mxu3 %v763_v51 }
 0x133   : > { %795 = vmatpush.msrb.mxu3 %v762_v52 }
 0x135   : > { %796 = vmatpush.msrb.mxu3 %v761_v53 }
 0x18c   : > { %v560_v10 = vpop.f32.mrf.mxu1 }
 0x18d   : > { %v561_v13 = vadd.f32 %v974_v9, %v560_v10 }
 0x196   : > { %v563_v20 = vpop.f32.mrf.mxu1 }
 0x197   : > { %v564_v22 = vadd.f32 %v974_v9, %v563_v20 }
 0x19f   : > { %v583_v15 = vpop.f32.mrf.mxu2  ;;  %v606_v16 = vpop.f32.mrf.mxu3 }
 0x1a0   : > { %v584_v17 = vadd.f32 %v583_v15, %v561_v13 }
 0x1a2   : > { %v607_v19 = vadd.f32 %v606_v16, %v584_v17 }
 0x1a4   : > { %v612_v21 = vmax.f32 %v607_v19, 0.0 }
 0x1a6   : > { %v617_v23 = vrot.slane %v612_v21, 4 }
 0x1a7   : > { %v586_v24 = vpop.f32.mrf.mxu2  ;;  %v609_v26 = vpop.f32.mrf.mxu3 }
 0x1a8   : > { %v587_v25 = vadd.f32 %v586_v24, %v564_v22  ;;  %923 = vmatmul.msk.f32.vlgmr.msrb.gmra.mxu0 %vm922_vm11, %v617_v23  ;;  %v622_v29 = vsel %vm616_vm10, 0.0, %v617_v23 }
 0x1a9   : > { %v624_v34 = vrot.slane %v622_v29, 2  ;;  %v631_v35 = vrot.slane %v622_v29, 4 }
 0x1aa   : > { %v610_v27 = vadd.f32 %v609_v26, %v587_v25 }
 0x1ac   : > { %v613_v28 = vmax.f32 %v610_v27, 0.0 }
 0x1ae   : > { %v618_v30 = vrot.slane %v613_v28, 4 }
 0x1b0   : > { %v619_v31 = vsel %vm616_vm10, %v617_v23, %v618_v30  ;;  %v627_v38 = vrot.slane %v618_v30, 2  ;;  %v634_v39 = vrot.slane %v618_v30, 4 }
 0x1b1   : > { %v625_v32 = vrot.slane %v619_v31, 2  ;;  %v632_v33 = vrot.slane %v619_v31, 4  ;;  %709 = vmatmul.f32.gmra.mxu0 %v619_v31 }
 0x1b3   : > { %v626_v36 = vsel %vm483_vm9, %v624_v34, %v625_v32  ;;  %v633_v37 = vsel %vm616_vm10, %v631_v35, %v632_v33  ;;  %v628_v40 = vsel %vm483_vm9, %v625_v32, %v627_v38  ;;  %v635_v41 = vsel %vm616_vm10, %v632_v33, %v634_v39 }
 0x1b4   : > { %729 = vmatmul.f32.vlgmr.msrb.gmra.mxu1 %v626_v36  ;;  %752 = vmatmul.f32.vlgmr.msrb.gmra.mxu2 %v633_v37 }
 0x1bc   : > { %732 = vmatmul.f32.gmra.mxu1 %v628_v40  ;;  %755 = vmatmul.f32.gmra.mxu2 %v635_v41 }
 0x225   : > { %v707_v54 = vpop.f32.mrf.mxu0 }
 0x226   : > { %v708_v57 = vadd.f32 %v975_v55, %v707_v54 }
 0x22e   : > { %v710_v61 = vpop.f32.mrf.mxu0 }
 0x22f   : > { %v711_v0 = vadd.f32 %v975_v55, %v710_v61 }
 0x231   : > { %v730_v56 = vpop.f32.mrf.mxu1 }
 0x232   : > { %v731_v58 = vadd.f32 %v730_v56, %v708_v57 }
 0x237   : > { %v753_v59 = vpop.f32.mrf.mxu2 }
 0x238   : > { %v754_v60 = vadd.f32 %v753_v59, %v731_v58 }
 0x239   : > { %v733_v63 = vpop.f32.mrf.mxu1 }
 0x23a   : > { %v759_v62 = vmax.f32 %v754_v60, 0.0  ;;  %v734_v1 = vadd.f32 %v733_v63, %v711_v0 }
 0x23c   : > { %797 = vmatmul.f32.vlgmr.msrb.gmra.mxu3 %v759_v62 }
 0x23f   : > { %v756_v2 = vpop.f32.mrf.mxu2 }
 0x240   : > { %v757_v3 = vadd.f32 %v756_v2, %v734_v1 }
 0x242   : > { %v760_v4 = vmax.f32 %v757_v3, 0.0 }
 0x244   : > { %800 = vmatmul.f32.gmra.mxu3 %v760_v4 }
 0x2bf   : > { %v798_v6 = vpop.f32.mrf.mxu3 }
 0x2c0   : > { %v799_v7 = vadd.f32 %v976_v5, %v798_v6 }
 0x2c2   : > { %804 = vst [vmem:[%s396_s24] sm:$0xff] %v799_v7 }
 0x2c7   : > { %v801_v8 = vpop.f32.mrf.mxu3 }
 0x2c8   : > { %v802_v9 = vadd.f32 %v976_v5, %v801_v8 }
 0x2ca   : > { %805 = vst [vmem:[%s396_s24 + $0x8] sm:$0xff] %v802_v9 }
 0x2cb PF: > { %s21_s30 = sadd.s32 1, %s1081_s30  }
 0x2cc   : > { %p18_p7 = scmp.ge.s32.totalorder %s21_s30, 4  }
 0x2ce   :  { %20 = sbr.rel (!%p18_p7) target bundleno = 2 (0x2), region = 102 }
 0x2d3   :  { %827 = vsyncpa [#allocation3], 1 }
 0x2d4   :  { %829 = vsyncpa [#allocation3 + $0x1], 1 }
 0x2d5   :  { %830 = vsyncpa [#allocation5], 1 }

// kernel: _lambda_.2
= control target key start
LH: loop header
LB: loop body
LE: loop exit
PB: predicated region body
PF: predicated region fallthrough
CT: control target
= control target key end

     0   :  { %v1138_v2 = vmov 0   ;;  %s1644_s0 = inlined_call_operand.vmem [shape: s32[16,1], index: 0, kind: input, shape index: {}]   ;;  %s1645_s1 = inlined_call_operand.vmem [shape: f32[64,32], index: 1, kind: input, shape index: {}]   ;;  %s1646_s2 = inlined_call_operand.vmem [shape: f32[32,192], index: 2, kind: input, shape index: {}]   ;;  %s1647_s3 = inlined_call_operand.vmem [shape: f32[1,192], index: 3, kind: input, shape index: {}]   ;;  %s1648_s4 = inlined_call_operand.vmem [shape: f32[64,192], index: 4, kind: input, shape index: {}]   ;;  %s1649_s5 = inlined_call_operand.vmem [shape: f32[1,192], index: 5, kind: input, shape index: {}]   ;;  %s1650_s6 = inlined_call_operand.vmem [shape: f32[64,16], index: 6, kind: input, shape index: {}]   ;;  %s1651_s7 = inlined_call_operand.vmem [shape: f32[1,16], index: 7, kind: input, shape index: {}]   ;;  %s1652_s8 = inlined_call_operand.vmem [shape: f32[64,16], index: 8, kind: input, shape index: {}]   ;;  %s1653_s9 = inlined_call_operand.vmem [shape: f32[1,16], index: 9, kind: input, shape index: {}]   ;;  %s1654_s10 = inlined_call_operand.vmem [shape: f32[2,16], index: 10, kind: input, shape index: {}]   ;;  %s1655_s11 = inlined_call_operand.vmem [shape: f32[2,16], index: 11, kind: output, shape index: {0}]   ;;  %s1656_s12 = inlined_call_operand.hbm [shape: f32[1,1], index: 12, kind: output, shape index: {1}]  }
   0x1   :  { %v43_v0 = vld [vmem:[%s1644_s0] sm:$0xff]  ;;  %v64_v1 = vld [vmem:[%s1645_s1 + $0x38] sm:$0xff]  ;;  %1057 = vset.pattern.permute.xlu0 %v1138_v2  ;;  %v63_v3 = vld [vmem:[%s1645_s1 + $0x30] sm:$0xff] }
   0x2   :  { %80 = vmatpush.msra.mxu0 %v64_v1  ;;  %46 = vperm.xlu0 %1057, %v43_v0   ;;  %v62_v4 = vld [vmem:[%s1645_s1 + $0x28] sm:$0xff] }
   0x4   :  { %81 = vmatpush.msra.mxu0 %v63_v3 }
   0x5   :  { %18 = vsyncpa [#allocation3], 0  ;;  %v61_v5 = vld [vmem:[%s1645_s1 + $0x20] sm:$0xff]  ;;  %v60_v6 = vld [vmem:[%s1645_s1 + $0x18] sm:$0xff]  ;;  %v41_v22 = vlaneseq  ;;  %vm65_vm0 = vcmask 523264   ;;  %v1139_v25 = vmov 0.0  }
   0x6   :  { %82 = vmatpush.msra.mxu0 %v62_v4  ;;  %v44_v7 = vld [vmem:[%s1644_s0 + $0x8] sm:$0xff]  ;;  %v59_v8 = vld [vmem:[%s1645_s1 + $0x10] sm:$0xff]  ;;  %v57_v10 = vld [vmem:[%s1645_s1] sm:$0xff]  ;;  %vm109_vm3 = vcmask 261120   ;;  %s1008_s25 = sshll.u32 %s1656_s12, 4  ;;  %s1009_s25 = int_to_ptr.hbm [resolvable:$true] %s1008_s25 }
   0x7   :  { %v58_v9 = vld [vmem:[%s1645_s1 + $0x8] sm:$0xff]  ;;  %v1240_v11 = vld [vmem:[%s1648_s4 + $0x70] sm:$0xff]  ;;  %v1245_v12 = vld [vmem:[%s1648_s4 + $0x60] sm:$0xff]  ;;  %v1285_v23 = vand.u32 127, %v41_v22 }
   0x8   :  { %83 = vmatpush.msra.mxu0 %v61_v5  ;;  %v101_v13 = vld [vmem:[%s1646_s2 + $0x30] sm:$0xff]  ;;  %226 = vmatpush.msra.mxu3 %v1240_v11  ;;  %v102_v14 = vld [vmem:[%s1646_s2 + $0x38] sm:$0xff]  ;;  %v99_v15 = vld [vmem:[%s1646_s2 + $0x20] sm:$0xff] }
   0x9   :  { %128 = vmatpush.msra.mxu1 %v101_v13  ;;  %151 = vmatpush.msra.mxu2 %v102_v14  ;;  %v1260_v16 = vld [vmem:[%s1648_s4 + $0x50] sm:$0xff]  ;;  %v100_v17 = vld [vmem:[%s1646_s2 + $0x28] sm:$0xff]  ;;  %v98_v19 = vld [vmem:[%s1646_s2 + $0x18] sm:$0xff]  ;;  %vm182_vm4 = vcmp.ge.s32.totalorder %v1285_v23, 64  ;;  %vm184_vm5 = vcmp.lt.s32.totalorder %v1285_v23, 96  ;;  %vm180_vm6 = vcmp.lt.s32.totalorder %v1285_v23, 32 }
   0xa   :  { %84 = vmatpush.msra.mxu0 %v60_v6  ;;  %49 = vperm.xlu0 %1057, %v44_v7   ;;  %v97_v18 = vld [vmem:[%s1646_s2 + $0x10] sm:$0xff]  ;;  %v1275_v20 = vld [vmem:[%s1648_s4 + $0x40] sm:$0xff]  ;;  %v96_v30 = vld [vmem:[%s1646_s2 + $0x8] sm:$0xff]  ;;  %v179_v59 = vadd.s32 128, %v1285_v23 }
   0xb   :  { %227 = vmatpush.msra.mxu3 %v1245_v12  ;;  %129 = vmatpush.msra.mxu1 %v99_v15  ;;  %v1281_v21 = vld [vmem:[%s1648_s4 + $0x30] sm:$0xff]  ;;  %v95_v29 = vld [vmem:[%s1646_s2] sm:$0xff]  ;;  %v1326_v34 = vld [vmem:[%s1648_s4 + $0x78] sm:$0xff] }
   0xc   :  { %85 = vmatpush.msra.mxu0 %v59_v8  ;;  %152 = vmatpush.msra.mxu2 %v100_v17  ;;  %v1302_v31 = vld [vmem:[%s1648_s4 + $0x20] sm:$0xff]  ;;  %v1308_v32 = vld [vmem:[%s1648_s4 + $0x10] sm:$0xff]  ;;  %v1331_v35 = vld [vmem:[%s1648_s4 + $0x68] sm:$0xff]  ;;  %vm193_vm9 = vcmp.lt.s32.totalorder %v179_v59, 160 }
   0xd   :  { %228 = vmatpush.msra.mxu3 %v1260_v16  ;;  %130 = vmatpush.msra.mxu1 %v97_v18  ;;  %v1314_v33 = vld [vmem:[%s1648_s4] sm:$0xff]  ;;  %v1340_v36 = vld [vmem:[%s1648_s4 + $0x58] sm:$0xff]  ;;  %v1349_v37 = vld [vmem:[%s1648_s4 + $0x48] sm:$0xff] }
   0xe   :  { %86 = vmatpush.msra.mxu0 %v58_v9  ;;  %153 = vmatpush.msra.mxu2 %v98_v19  ;;  %v1358_v38 = vld [vmem:[%s1648_s4 + $0x38] sm:$0xff]  ;;  %v1367_v39 = vld [vmem:[%s1648_s4 + $0x28] sm:$0xff]  ;;  %v103_v44 = vld [vmem:[%s1647_s3] sm:$0x3]  ;;  %s1140_s3 = smov 64  }
   0xf   :  { %229 = vmatpush.msra.mxu3 %v1275_v20  ;;  %131 = vmatpush.msra.mxu1 %v95_v29  ;;  %v1375_v40 = vld [vmem:[%s1648_s4 + $0x18] sm:$0xff]  ;;  %v1383_v41 = vld [vmem:[%s1648_s4 + $0x8] sm:$0xff]  ;;  %v105_v46 = vperm.slane %v103_v44, 0  ;;  %v178_v47 = vld [vmem:[%s1649_s5] sm:$0x3]  ;;  %v106_v49 = vperm.slane %v103_v44, 1 }
  0x10   :  { %87 = vmatpush.msra.mxu0 %v57_v10  ;;  %154 = vmatpush.msra.mxu2 %v96_v30  ;;  %vm186_vm7 = vmand %vm182_vm4, %vm184_vm5  ;;  %v1444_v51 = vperm.slane %v178_v47, 0  ;;  %v1466_v19 = vperm.slane %v178_v47, 1 }
  0x11   :  { %230 = vmatpush.msra.mxu3 %v1281_v21  ;;  %246 = vmatpush.msrb.mxu1 %v1326_v34  ;;  %vm188_vm8 = vmor %vm180_vm6, %vm186_vm7 }
  0x12   :  { %308 = vmatpush.msrb.mxu2 %v1240_v11  ;;  %328 = vmatpush.msrb.mxu0 %v1326_v34 }
  0x13   :  { %231 = vmatpush.msra.mxu3 %v1302_v31  ;;  %247 = vmatpush.msrb.mxu1 %v1331_v35 }
  0x14   :  { %309 = vmatpush.msrb.mxu2 %v1245_v12  ;;  %329 = vmatpush.msrb.mxu0 %v1331_v35 }
  0x15   :  { %232 = vmatpush.msra.mxu3 %v1308_v32  ;;  %248 = vmatpush.msrb.mxu1 %v1340_v36 }
  0x16   :  { %310 = vmatpush.msrb.mxu2 %v1260_v16  ;;  %330 = vmatpush.msrb.mxu0 %v1340_v36 }
  0x17   :  { %233 = vmatpush.msra.mxu3 %v1314_v33  ;;  %249 = vmatpush.msrb.mxu1 %v1349_v37 }
  0x18   :  { %234 = vmatmul.f32.vlgmr.msra.gmra.mxu3 %v1139_v25  ;;  %311 = vmatpush.msrb.mxu2 %v1275_v20 }
  0x19   :  { %393 = vmatpush.msrb.mxu3 %v1240_v11  ;;  %331 = vmatpush.msrb.mxu0 %v1349_v37 }
  0x1a   :  { %312 = vmatpush.msrb.mxu2 %v1281_v21  ;;  %250 = vmatpush.msrb.mxu1 %v1358_v38 }
  0x1b   :  { %394 = vmatpush.msrb.mxu3 %v1245_v12  ;;  %332 = vmatpush.msrb.mxu0 %v1358_v38 }
  0x1c   :  { %313 = vmatpush.msrb.mxu2 %v1302_v31  ;;  %251 = vmatpush.msrb.mxu1 %v1367_v39 }
  0x1d   :  { %395 = vmatpush.msrb.mxu3 %v1260_v16  ;;  %333 = vmatpush.msrb.mxu0 %v1367_v39 }
  0x1e   :  { %314 = vmatpush.msrb.mxu2 %v1308_v32  ;;  %252 = vmatpush.msrb.mxu1 %v1375_v40 }
  0x1f   :  { %396 = vmatpush.msrb.mxu3 %v1275_v20  ;;  %334 = vmatpush.msrb.mxu0 %v1375_v40 }
  0x20   :  { %315 = vmatpush.msrb.mxu2 %v1314_v33  ;;  %253 = vmatpush.msrb.mxu1 %v1383_v41 }
  0x21   :  { %397 = vmatpush.msrb.mxu3 %v1281_v21  ;;  %335 = vmatpush.msrb.mxu0 %v1383_v41 }
  0x23   :  { %398 = vmatpush.msrb.mxu3 %v1302_v31 }
  0x25   :  { %399 = vmatpush.msrb.mxu3 %v1308_v32 }
  0x27   :  { %400 = vmatpush.msrb.mxu3 %v1314_v33 }
  0x29   :  { %571 = vmatpush.msra.mxu3 %v1240_v11 }
  0x2b   :  { %572 = vmatpush.msra.mxu3 %v1245_v12 }
  0x2d   :  { %573 = vmatpush.msra.mxu3 %v1260_v16 }
  0x2f   :  { %574 = vmatpush.msra.mxu3 %v1275_v20 }
  0x31   :  { %575 = vmatpush.msra.mxu3 %v1281_v21 }
  0x33   :  { %576 = vmatpush.msra.mxu3 %v1302_v31 }
  0x35   :  { %577 = vmatpush.msra.mxu3 %v1308_v32 }
  0x37   :  { %578 = vmatpush.msra.mxu3 %v1314_v33 }
  0x74   :  { %v47_v24 = vpop.permute.xlu0 %46 }
  0x75   :  { %vm51_vm1 = vcmp.eq.s32.totalorder %v47_v24, %v1285_v23 }
  0x76   :  { %v1019_v26 = vsel %vm51_vm1, 1.0, %v1139_v25 }
  0x77   :  { %1021 = vmatmul.msk.f32.vlgmr.msra.gmra.mxu0 %vm65_vm0, %v1019_v26 }
  0x78   :  { %498 = vmatpush.msra.mxu0 %v1326_v34 }
  0x7a   :  { %499 = vmatpush.msra.mxu0 %v1331_v35 }
  0x7c   :  { %v50_v27 = vpop.permute.xlu0 %49  ;;  %500 = vmatpush.msra.mxu0 %v1340_v36 }
  0x7d   :  { %vm52_vm2 = vcmp.eq.s32.totalorder %v50_v27, %v1285_v23 }
  0x7e   :  { %v1020_v28 = vsel %vm52_vm2, 1.0, %v1139_v25  ;;  %501 = vmatpush.msra.mxu0 %v1349_v37 }
  0x7f   :  { %1022 = vmatmul.msk.f32.gmra.mxu0 %vm65_vm0, %v1020_v28 }
  0x80   :  { %502 = vmatpush.msra.mxu0 %v1358_v38 }
  0x82   :  { %503 = vmatpush.msra.mxu0 %v1367_v39 }
  0x84   :  { %504 = vmatpush.msra.mxu0 %v1375_v40 }
  0x86   :  { %505 = vmatpush.msra.mxu0 %v1383_v41 }
  0x9b   :  { %v235_v52 = vpop.f32.mrf.mxu3 }
  0x9c   :  { %v236_v58 = vadd.f32 %v235_v52, %v1444_v51 }
  0xf4   :  { %v89_v42 = vpop.f32.mrf.mxu0 }
  0xf5   :  { %1023 = vmatmul.msk.f32.vlgmr.msra.gmra.mxu1 %vm109_vm3, %v89_v42  ;;  %1025 = vmatmul.msk.f32.vlgmr.msra.gmra.mxu2 %vm109_vm3, %v89_v42 }
  0xf6   :  { %413 = vmatpush.msra.mxu1 %v1326_v34  ;;  %478 = vmatpush.msra.mxu2 %v1240_v11 }
  0xf8   :  { %414 = vmatpush.msra.mxu1 %v1331_v35  ;;  %479 = vmatpush.msra.mxu2 %v1245_v12 }
  0xfa   :  { %415 = vmatpush.msra.mxu1 %v1340_v36  ;;  %480 = vmatpush.msra.mxu2 %v1260_v16 }
  0xfc   :  { %v92_v43 = vpop.f32.mrf.mxu0  ;;  %416 = vmatpush.msra.mxu1 %v1349_v37  ;;  %481 = vmatpush.msra.mxu2 %v1275_v20 }
  0xfd   :  { %1024 = vmatmul.msk.f32.gmra.mxu1 %vm109_vm3, %v92_v43  ;;  %1026 = vmatmul.msk.f32.gmra.mxu2 %vm109_vm3, %v92_v43 }
  0xfe   :  { %417 = vmatpush.msra.mxu1 %v1358_v38  ;;  %482 = vmatpush.msra.mxu2 %v1281_v21 }
 0x100   :  { %418 = vmatpush.msra.mxu1 %v1367_v39  ;;  %483 = vmatpush.msra.mxu2 %v1302_v31 }
 0x102   :  { %419 = vmatpush.msra.mxu1 %v1375_v40  ;;  %484 = vmatpush.msra.mxu2 %v1308_v32 }
 0x104   :  { %420 = vmatpush.msra.mxu1 %v1383_v41  ;;  %485 = vmatpush.msra.mxu2 %v1314_v33 }
 0x105   :  { %254 = vmatmul.f32.vlgmr.msrb.gmra.mxu1 %v1139_v25 }
 0x106   :  { %591 = vmatpush.msrb.mxu1 %v1326_v34 }
 0x108   :  { %592 = vmatpush.msrb.mxu1 %v1331_v35 }
 0x10a   :  { %593 = vmatpush.msrb.mxu1 %v1340_v36 }
 0x10c   :  { %594 = vmatpush.msrb.mxu1 %v1349_v37 }
 0x10e   :  { %595 = vmatpush.msrb.mxu1 %v1358_v38 }
 0x110   :  { %596 = vmatpush.msrb.mxu1 %v1367_v39 }
 0x112   :  { %597 = vmatpush.msrb.mxu1 %v1375_v40 }
 0x114   :  { %598 = vmatpush.msrb.mxu1 %v1383_v41 }
 0x172   :  { %v133_v45 = vpop.f32.mrf.mxu1 }
 0x173   :  { %v134_v48 = vadd.f32 %v133_v45, %v105_v46 }
 0x175   :  { %v551_v55 = vrot.slane %v134_v48, 6  ;;  %v635_v56 = vrot.slane %v134_v48, 2 }
 0x178   :  { %v156_v50 = vpop.f32.mrf.mxu2 }
 0x179   :  { %v157_v57 = vadd.f32 %v156_v50, %v106_v49 }
 0x17a   :  { %v136_v53 = vpop.f32.mrf.mxu1 }
 0x17b   :  { %v137_v54 = vadd.f32 %v136_v53, %v105_v46  ;;  %v552_v4 = vrot.slane %v157_v57, 6  ;;  %v636_v5 = vrot.slane %v157_v57, 2 }
 0x17d   :  { %v204_v60 = vrot.slane %v137_v54, 6  ;;  %v289_v61 = vrot.slane %v137_v54, 2  ;;  %v1448_v62 = vsel %vm188_vm8, %v137_v54, %v551_v55  ;;  %v1450_v63 = vsel %vm188_vm8, %v137_v54, %v635_v56 }
 0x17f   :  { %v1452_v0 = vsel %vm188_vm8, %v134_v48, %v204_v60  ;;  %v1454_v1 = vsel %vm188_vm8, %v134_v48, %v289_v61 }
 0x180   :  { %v258_v2 = vadd.f32 %v236_v58, %v1452_v0  ;;  %v159_v3 = vpop.f32.mrf.mxu2 }
 0x181   :  { %v160_v6 = vadd.f32 %v159_v3, %v106_v49 }
 0x182   :  { %v1027_v7 = vmul.f32 -1.442695, %v258_v2  ;;  %v255_v23 = vpop.f32.mrf.mxu1 }
 0x183   :  { %v290_v8 = vrot.slane %v160_v6, 2  ;;  %v1458_v9 = vsel %vm193_vm9, %v160_v6, %v552_v4  ;;  %v1461_v10 = vsel %vm193_vm9, %v160_v6, %v636_v5  ;;  %v256_v27 = vadd.f32 %v255_v23, %v1466_v19 }
 0x184   :  { %1060 = vpow2.f32 %v1027_v7  ;;  %v205_v29 = vrot.slane %v160_v6, 6 }
 0x185   :  { %v1464_v13 = vsel %vm193_vm9, %v157_v57, %v290_v8 }
 0x186   :  { %v1470_v45 = vsel %vm193_vm9, %v157_v57, %v205_v29 }
 0x18a   :  { %v1061_v14 = vpop.eup %1060 }
 0x18b   :  { %v262_v15 = vadd.f32 1.0, %v1061_v14 }
 0x18d   :  { %1062 = vrcp.f32 %v262_v15  ;;  %v274_v24 = vand.u32 2147483648, %v262_v15  ;;  %v272_v26 = vand.u32 2147483647, %v262_v15  ;;  %vm268_vm11 = vweird.f32 %v262_v15 }
 0x18f   :  { %v275_v30 = vor.u32 1.1754944e-38, %v274_v24  ;;  %vm273_vm13 = vcmp.eq.f32.partialorder %v272_v26, 8.507059e+37 }
 0x193   :  { %v1063_v17 = vpop.eup %1062 }
 0x194   :  { %v264_v18 = vmul.f32 %v1063_v17, %v262_v15  ;;  %vm269_vm10 = vweird.f32 %v1063_v17 }
 0x195   :  { %vm270_vm12 = vmor %vm268_vm11, %vm269_vm10 }
 0x196   :  { %v265_v22 = vsub.f32 1.0, %v264_v18 }
 0x198   :  { %v266_v25 = vmul.f32 %v1063_v17, %v265_v22 }
 0x19a   :  { %v267_v28 = vadd.f32 %v1063_v17, %v266_v25 }
 0x19c   :  { %v271_v42 = vsel %vm270_vm12, %v1063_v17, %v267_v28 }
 0x19d   :  { %v276_v43 = vsel %vm273_vm13, %v275_v30, %v271_v42 }
 0x19e   :  { %v278_v44 = vmul.f32 %v276_v43, %v256_v27  ;;  %v281_v48 = vsub.f32 1.0, %v276_v43  ;;  %v287_v50 = vmul.f32 0.0, %v276_v43 }
 0x1a0   :  { %v279_v46 = vadd.f32 %v278_v44, %v1470_v45 }
 0x1a2   :  { %1064 = vtanh.f32 %v279_v46 }
 0x1a8   :  { %v1065_v47 = vpop.eup %1064 }
 0x1a9   :  { %283 = vrot.lane.b32.xlu1 %v1065_v47, %s1140_s3 }
 0x21b   :  { %v284_v49 = vpop.permute.xlu1 %283 }
 0x21c   :  { %v286_v52 = vmul.f32 %v284_v49, %v281_v48 }
 0x21e   :  { %v288_v53 = vadd.f32 %v287_v50, %v286_v52 }
 0x220   :  { %296 = vrot.lane.b32.xlu1 %v288_v53, %s1140_s3  ;;  %v375_v18 = vrot.slane %v288_v53, 6 }
 0x292   :  { %v297_v54 = vpop.permute.xlu1 %296 }
 0x293   :  { %1028 = vmatmul.msk.f32.vlgmr.msrb.gmra.mxu2 %vm65_vm0, %v297_v54  ;;  %1029 = vmatmul.msk.f32.vlgmr.msrb.gmra.mxu0 %vm65_vm0, %v297_v54 }
 0x294   :  { %654 = vmatpush.msrb.mxu2 %v1240_v11  ;;  %674 = vmatpush.msrb.mxu0 %v1326_v34 }
 0x296   :  { %655 = vmatpush.msrb.mxu2 %v1245_v12  ;;  %675 = vmatpush.msrb.mxu0 %v1331_v35 }
 0x298   :  { %656 = vmatpush.msrb.mxu2 %v1260_v16  ;;  %676 = vmatpush.msrb.mxu0 %v1340_v36 }
 0x29a   :  { %657 = vmatpush.msrb.mxu2 %v1275_v20  ;;  %677 = vmatpush.msrb.mxu0 %v1349_v37 }
 0x29c   :  { %658 = vmatpush.msrb.mxu2 %v1281_v21  ;;  %678 = vmatpush.msrb.mxu0 %v1358_v38 }
 0x29e   :  { %659 = vmatpush.msrb.mxu2 %v1302_v31  ;;  %679 = vmatpush.msrb.mxu0 %v1367_v39 }
 0x2a0   :  { %660 = vmatpush.msrb.mxu2 %v1308_v32  ;;  %680 = vmatpush.msrb.mxu0 %v1375_v40 }
 0x2a2   :  { %661 = vmatpush.msrb.mxu2 %v1314_v33  ;;  %681 = vmatpush.msrb.mxu0 %v1383_v41 }
 0x310   :  { %v337_v4 = vpop.f32.mrf.mxu0 }
 0x311   :  { %v338_v7 = vadd.f32 %v337_v4, %v1466_v19 }
 0x313   :  { %v364_v22 = vrot.slane %v338_v7, 6 }
 0x316   :  { %v317_v55 = vpop.f32.mrf.mxu2 }
 0x317   :  { %v318_v56 = vadd.f32 %v317_v55, %v1444_v51 }
 0x319   :  { %v341_v57 = vrot.slane %v318_v56, 6 }
 0x31b   :  { %v343_v58 = vadd.f32 %v341_v57, %v1454_v1 }
 0x31d   :  { %v1030_v59 = vmul.f32 -1.442695, %v343_v58 }
 0x31f   :  { %1066 = vpow2.f32 %v1030_v59 }
 0x325   :  { %v1067_v60 = vpop.eup %1066 }
 0x326   :  { %v347_v61 = vadd.f32 1.0, %v1067_v60 }
 0x328   :  { %1068 = vrcp.f32 %v347_v61  ;;  %v359_v6 = vand.u32 2147483648, %v347_v61  ;;  %v357_v14 = vand.u32 2147483647, %v347_v61  ;;  %vm353_vm15 = vweird.f32 %v347_v61 }
 0x32a   :  { %v360_v17 = vor.u32 1.1754944e-38, %v359_v6  ;;  %vm358_vm2 = vcmp.eq.f32.partialorder %v357_v14, 8.507059e+37 }
 0x32e   :  { %v1069_v2 = vpop.eup %1068 }
 0x32f   :  { %v349_v3 = vmul.f32 %v1069_v2, %v347_v61  ;;  %vm354_vm14 = vweird.f32 %v1069_v2 }
 0x330   :  { %vm355_vm1 = vmor %vm353_vm15, %vm354_vm14 }
 0x331   :  { %v350_v5 = vsub.f32 1.0, %v349_v3 }
 0x333   :  { %v351_v8 = vmul.f32 %v1069_v2, %v350_v5 }
 0x335   :  { %v352_v15 = vadd.f32 %v1069_v2, %v351_v8 }
 0x337   :  { %v356_v23 = vsel %vm355_vm1, %v1069_v2, %v352_v15 }
 0x338   :  { %v361_v24 = vsel %vm358_vm2, %v360_v17, %v356_v23 }
 0x339   :  { %v366_v25 = vmul.f32 %v364_v22, %v361_v24  ;;  %v377_v26 = vmul.f32 %v375_v18, %v361_v24  ;;  %v369_v29 = vsub.f32 1.0, %v361_v24 }
 0x33b   :  { %v367_v27 = vadd.f32 %v366_v25, %v1464_v13 }
 0x33d   :  { %1070 = vtanh.f32 %v367_v27 }
 0x343   :  { %v1071_v28 = vpop.eup %1070 }
 0x344   :  { %371 = vrot.lane.b32.xlu2 %v1071_v28, %s1140_s3 }
 0x39e   :  { %v372_v30 = vpop.permute.xlu2 %371 }
 0x39f   :  { %v374_v42 = vmul.f32 %v372_v30, %v369_v29 }
 0x3a1   :  { %v378_v43 = vadd.f32 %v377_v26, %v374_v42 }
 0x3a3   :  { %v380_v44 = vrot.slane %v378_v43, 2 }
 0x3a5   :  { %381 = vrot.lane.b32.xlu2 %v380_v44, %s1140_s3 }
 0x3ff   :  { %v382_v46 = vpop.permute.xlu2 %381 }
 0x400   :  { %1031 = vmatmul.msk.f32.vlgmr.msrb.gmra.mxu3 %vm65_vm0, %v382_v46  ;;  %1032 = vmatmul.msk.f32.vlgmr.msra.gmra.mxu1 %vm65_vm0, %v382_v46 }
 0x401   :  { %739 = vmatpush.msrb.mxu3 %v1240_v11  ;;  %759 = vmatpush.msra.mxu1 %v1326_v34 }
 0x403   :  { %740 = vmatpush.msrb.mxu3 %v1245_v12  ;;  %760 = vmatpush.msra.mxu1 %v1331_v35 }
 0x405   :  { %741 = vmatpush.msrb.mxu3 %v1260_v16  ;;  %761 = vmatpush.msra.mxu1 %v1340_v36 }
 0x407   :  { %742 = vmatpush.msrb.mxu3 %v1275_v20  ;;  %762 = vmatpush.msra.mxu1 %v1349_v37 }
 0x409   :  { %743 = vmatpush.msrb.mxu3 %v1281_v21  ;;  %763 = vmatpush.msra.mxu1 %v1358_v38 }
 0x40b   :  { %744 = vmatpush.msrb.mxu3 %v1302_v31  ;;  %764 = vmatpush.msra.mxu1 %v1367_v39 }
 0x40d   :  { %745 = vmatpush.msrb.mxu3 %v1308_v32  ;;  %765 = vmatpush.msra.mxu1 %v1375_v40 }
 0x40f   :  { %746 = vmatpush.msrb.mxu3 %v1314_v33  ;;  %766 = vmatpush.msra.mxu1 %v1383_v41 }
 0x47d   :  { %v422_v57 = vpop.f32.mrf.mxu1 }
 0x47e   :  { %v423_v60 = vadd.f32 %v422_v57, %v1466_v19 }
 0x480   :  { %v449_v5 = vrot.slane %v423_v60, 4 }
 0x483   :  { %v402_v47 = vpop.f32.mrf.mxu3 }
 0x484   :  { %v403_v48 = vadd.f32 %v402_v47, %v1444_v51 }
 0x486   :  { %v426_v49 = vrot.slane %v403_v48, 4 }
 0x488   :  { %v428_v50 = vadd.f32 %v426_v49, %v1452_v0  ;;  %v460_v0 = vrot.slane %v378_v43, 6 }
 0x48a   :  { %v1033_v52 = vmul.f32 -1.442695, %v428_v50 }
 0x48c   :  { %1072 = vpow2.f32 %v1033_v52 }
 0x492   :  { %v1073_v53 = vpop.eup %1072 }
 0x493   :  { %v432_v54 = vadd.f32 1.0, %v1073_v53 }
 0x495   :  { %1074 = vrcp.f32 %v432_v54  ;;  %v444_v59 = vand.u32 2147483648, %v432_v54  ;;  %v442_v2 = vand.u32 2147483647, %v432_v54  ;;  %vm438_vm4 = vweird.f32 %v432_v54 }
 0x497   :  { %v445_v4 = vor.u32 1.1754944e-38, %v444_v59  ;;  %vm443_vm6 = vcmp.eq.f32.partialorder %v442_v2, 8.507059e+37 }
 0x49b   :  { %v1075_v55 = vpop.eup %1074 }
 0x49c   :  { %v434_v56 = vmul.f32 %v1075_v55, %v432_v54  ;;  %vm439_vm3 = vweird.f32 %v1075_v55 }
 0x49d   :  { %vm440_vm5 = vmor %vm438_vm4, %vm439_vm3 }
 0x49e   :  { %v435_v58 = vsub.f32 1.0, %v434_v56 }
 0x4a0   :  { %v436_v61 = vmul.f32 %v1075_v55, %v435_v58 }
 0x4a2   :  { %v437_v3 = vadd.f32 %v1075_v55, %v436_v61 }
 0x4a4   :  { %v441_v6 = vsel %vm440_vm5, %v1075_v55, %v437_v3 }
 0x4a5   :  { %v446_v7 = vsel %vm443_vm6, %v445_v4, %v441_v6 }
 0x4a6   :  { %v451_v8 = vmul.f32 %v449_v5, %v446_v7  ;;  %v462_v14 = vmul.f32 %v460_v0, %v446_v7  ;;  %v454_v18 = vsub.f32 1.0, %v446_v7 }
 0x4a8   :  { %v452_v15 = vadd.f32 %v451_v8, %v1470_v45 }
 0x4aa   :  { %1076 = vtanh.f32 %v452_v15 }
 0x4b0   :  { %v1077_v17 = vpop.eup %1076 }
 0x4b1   :  { %456 = vrot.lane.b32.xlu0 %v1077_v17, %s1140_s3 }
 0x523   :  { %v457_v22 = vpop.permute.xlu0 %456 }
 0x524   :  { %v459_v23 = vmul.f32 %v457_v22, %v454_v18 }
 0x526   :  { %v463_v24 = vadd.f32 %v462_v14, %v459_v23 }
 0x528   :  { %v465_v25 = vrot.slane %v463_v24, 4 }
 0x52a   :  { %466 = vrot.lane.b32.xlu1 %v465_v25, %s1140_s3 }
 0x59c   :  { %v467_v26 = vpop.permute.xlu1 %466 }
 0x59d   :  { %1034 = vmatmul.msk.f32.vlgmr.msra.gmra.mxu2 %vm65_vm0, %v467_v26  ;;  %1035 = vmatmul.msk.f32.vlgmr.msra.gmra.mxu0 %vm65_vm0, %v467_v26 }
 0x59e   :  { %824 = vmatpush.msra.mxu2 %v1240_v11  ;;  %844 = vmatpush.msra.mxu0 %v1326_v34 }
 0x5a0   :  { %825 = vmatpush.msra.mxu2 %v1245_v12  ;;  %845 = vmatpush.msra.mxu0 %v1331_v35 }
 0x5a2   :  { %826 = vmatpush.msra.mxu2 %v1260_v16  ;;  %846 = vmatpush.msra.mxu0 %v1340_v36 }
 0x5a4   :  { %827 = vmatpush.msra.mxu2 %v1275_v20  ;;  %847 = vmatpush.msra.mxu0 %v1349_v37 }
 0x5a6   :  { %828 = vmatpush.msra.mxu2 %v1281_v21  ;;  %848 = vmatpush.msra.mxu0 %v1358_v38 }
 0x5a8   :  { %829 = vmatpush.msra.mxu2 %v1302_v31  ;;  %849 = vmatpush.msra.mxu0 %v1367_v39 }
 0x5aa   :  { %830 = vmatpush.msra.mxu2 %v1308_v32  ;;  %850 = vmatpush.msra.mxu0 %v1375_v40 }
 0x5ac   :  { %831 = vmatpush.msra.mxu2 %v1314_v33  ;;  %851 = vmatpush.msra.mxu0 %v1383_v41 }
 0x61a   :  { %v507_v32 = vpop.f32.mrf.mxu0 }
 0x61b   :  { %v508_v33 = vadd.f32 %v507_v32, %v1466_v19 }
 0x61d   :  { %v534_v27 = vrot.slane %v508_v33, 2 }
 0x620   :  { %v487_v11 = vpop.f32.mrf.mxu2 }
 0x621   :  { %v488_v12 = vadd.f32 %v487_v11, %v1444_v51 }
 0x623   :  { %v511_v16 = vrot.slane %v488_v12, 2 }
 0x625   :  { %v513_v20 = vadd.f32 %v511_v16, %v1454_v1  ;;  %v545_v1 = vrot.slane %v463_v24, 6 }
 0x627   :  { %v1036_v21 = vmul.f32 -1.442695, %v513_v20 }
 0x629   :  { %1078 = vpow2.f32 %v1036_v21 }
 0x62f   :  { %v1079_v34 = vpop.eup %1078 }
 0x630   :  { %v517_v31 = vadd.f32 1.0, %v1079_v34 }
 0x632   :  { %1080 = vrcp.f32 %v517_v31  ;;  %v529_v38 = vand.u32 2147483648, %v517_v31  ;;  %v527_v40 = vand.u32 2147483647, %v517_v31  ;;  %vm523_vm8 = vweird.f32 %v517_v31 }
 0x634   :  { %v530_v45 = vor.u32 1.1754944e-38, %v529_v38  ;;  %vm528_vm10 = vcmp.eq.f32.partialorder %v527_v40, 8.507059e+37 }
 0x638   :  { %v1081_v35 = vpop.eup %1080 }
 0x639   :  { %v519_v36 = vmul.f32 %v1081_v35, %v517_v31  ;;  %vm524_vm7 = vweird.f32 %v1081_v35 }
 0x63a   :  { %vm525_vm9 = vmor %vm523_vm8, %vm524_vm7 }
 0x63b   :  { %v520_v37 = vsub.f32 1.0, %v519_v36 }
 0x63d   :  { %v521_v39 = vmul.f32 %v1081_v35, %v520_v37 }
 0x63f   :  { %v522_v41 = vadd.f32 %v1081_v35, %v521_v39 }
 0x641   :  { %v526_v28 = vsel %vm525_vm9, %v1081_v35, %v522_v41 }
 0x642   :  { %v531_v29 = vsel %vm528_vm10, %v530_v45, %v526_v28 }
 0x643   :  { %v536_v30 = vmul.f32 %v534_v27, %v531_v29  ;;  %v547_v42 = vmul.f32 %v545_v1, %v531_v29  ;;  %v539_v46 = vsub.f32 1.0, %v531_v29 }
 0x645   :  { %v537_v43 = vadd.f32 %v536_v30, %v1464_v13 }
 0x647   :  { %1082 = vtanh.f32 %v537_v43 }
 0x64d   :  { %v1083_v44 = vpop.eup %1082 }
 0x64e   :  { %541 = vrot.lane.b32.xlu2 %v1083_v44, %s1140_s3 }
 0x6a8   :  { %v542_v47 = vpop.permute.xlu2 %541 }
 0x6a9   :  { %v544_v48 = vmul.f32 %v542_v47, %v539_v46 }
 0x6ab   :  { %v548_v49 = vadd.f32 %v547_v42, %v544_v48 }
 0x6ad   :  { %v558_v50 = vrot.slane %v548_v49, 6 }
 0x6af   :  { %559 = vrot.lane.b32.xlu0 %v558_v50, %s1140_s3 }
 0x721   :  { %v560_v52 = vpop.permute.xlu0 %559 }
 0x722   :  { %1037 = vmatmul.msk.f32.vlgmr.msra.gmra.mxu3 %vm65_vm0, %v560_v52  ;;  %1038 = vmatmul.msk.f32.vlgmr.msrb.gmra.mxu1 %vm65_vm0, %v560_v52 }
 0x79f   :  { %v600_v4 = vpop.f32.mrf.mxu1 }
 0x7a0   :  { %v601_v6 = vadd.f32 %v600_v4, %v1466_v19 }
 0x7a5   :  { %v580_v53 = vpop.f32.mrf.mxu3 }
 0x7a6   :  { %v581_v54 = vadd.f32 %v580_v53, %v1444_v51 }
 0x7a8   :  { %v603_v13 = vadd.f32 %v581_v54, %v1448_v62 }
 0x7aa   :  { %v1039_v55 = vmul.f32 -1.442695, %v603_v13 }
 0x7ac   :  { %1084 = vpow2.f32 %v1039_v55 }
 0x7b2   :  { %v1085_v56 = vpop.eup %1084 }
 0x7b3   :  { %v607_v57 = vadd.f32 1.0, %v1085_v56 }
 0x7b5   :  { %1086 = vrcp.f32 %v607_v57  ;;  %v619_v61 = vand.u32 2147483648, %v607_v57  ;;  %v617_v3 = vand.u32 2147483647, %v607_v57  ;;  %vm613_vm12 = vweird.f32 %v607_v57 }
 0x7b7   :  { %v620_v5 = vor.u32 1.1754944e-38, %v619_v61  ;;  %vm618_vm14 = vcmp.eq.f32.partialorder %v617_v3, 8.507059e+37 }
 0x7bb   :  { %v1087_v58 = vpop.eup %1086 }
 0x7bc   :  { %v609_v59 = vmul.f32 %v1087_v58, %v607_v57  ;;  %vm614_vm11 = vweird.f32 %v1087_v58 }
 0x7bd   :  { %vm615_vm13 = vmor %vm613_vm12, %vm614_vm11  ;;  %vm983_vm12 = vcmask 1024  }
 0x7be   :  { %v610_v60 = vsub.f32 1.0, %v609_v59 }
 0x7c0   :  { %v611_v2 = vmul.f32 %v1087_v58, %v610_v60 }
 0x7c2   :  { %v612_v0 = vadd.f32 %v1087_v58, %v611_v2 }
 0x7c4   :  { %v616_v7 = vsel %vm615_vm13, %v1087_v58, %v612_v0  ;;  %vm997_vm13 = vcmask 0  }
 0x7c5   :  { %v621_v8 = vsel %vm618_vm14, %v620_v5, %v616_v7 }
 0x7c6   :  { %v623_v14 = vmul.f32 %v621_v8, %v601_v6  ;;  %v626_v18 = vsub.f32 1.0, %v621_v8  ;;  %v633_v23 = vmul.f32 %v621_v8, %v558_v50 }
 0x7c8   :  { %v624_v15 = vadd.f32 %v623_v14, %v1458_v9 }
 0x7ca   :  { %1088 = vtanh.f32 %v624_v15 }
 0x7d0   :  { %v1089_v17 = vpop.eup %1088 }
 0x7d1   :  { %628 = vrot.lane.b32.xlu1 %v1089_v17, %s1140_s3 }
 0x843   :  { %v629_v22 = vpop.permute.xlu1 %628 }
 0x844   :  { %v631_v24 = vmul.f32 %v629_v22, %v626_v18 }
 0x846   :  { %v634_v25 = vadd.f32 %v633_v23, %v631_v24 }
 0x848   :  { %642 = vrot.lane.b32.xlu2 %v634_v25, %s1140_s3  ;;  %v721_v1 = vrot.slane %v634_v25, 6 }
 0x8a2   :  { %v643_v26 = vpop.permute.xlu2 %642 }
 0x8a3   :  { %1040 = vmatmul.msk.f32.vlgmr.msrb.gmra.mxu2 %vm65_vm0, %v643_v26  ;;  %1041 = vmatmul.msk.f32.vlgmr.msrb.gmra.mxu0 %vm65_vm0, %v643_v26 }
 0x920   :  { %v683_v32 = vpop.f32.mrf.mxu0 }
 0x921   :  { %v684_v33 = vadd.f32 %v683_v32, %v1466_v19 }
 0x923   :  { %v710_v27 = vrot.slane %v684_v33, 6 }
 0x926   :  { %v663_v11 = vpop.f32.mrf.mxu2 }
 0x927   :  { %v664_v12 = vadd.f32 %v663_v11, %v1444_v51 }
 0x929   :  { %v687_v16 = vrot.slane %v664_v12, 6 }
 0x92b   :  { %v689_v20 = vadd.f32 %v687_v16, %v1450_v63 }
 0x92d   :  { %v1042_v21 = vmul.f32 -1.442695, %v689_v20 }
 0x92f   :  { %1090 = vpow2.f32 %v1042_v21 }
 0x935   :  { %v1091_v34 = vpop.eup %1090 }
 0x936   :  { %v693_v31 = vadd.f32 1.0, %v1091_v34 }
 0x938   :  { %1092 = vrcp.f32 %v693_v31  ;;  %v705_v38 = vand.u32 2147483648, %v693_v31  ;;  %v703_v40 = vand.u32 2147483647, %v693_v31  ;;  %vm699_vm1 = vweird.f32 %v693_v31 }
 0x93a   :  { %v706_v45 = vor.u32 1.1754944e-38, %v705_v38  ;;  %vm704_vm3 = vcmp.eq.f32.partialorder %v703_v40, 8.507059e+37 }
 0x93e   :  { %v1093_v35 = vpop.eup %1092 }
 0x93f   :  { %v695_v36 = vmul.f32 %v1093_v35, %v693_v31  ;;  %vm700_vm15 = vweird.f32 %v1093_v35 }
 0x940   :  { %vm701_vm2 = vmor %vm699_vm1, %vm700_vm15 }
 0x941   :  { %v696_v37 = vsub.f32 1.0, %v695_v36 }
 0x943   :  { %v697_v39 = vmul.f32 %v1093_v35, %v696_v37 }
 0x945   :  { %v698_v41 = vadd.f32 %v1093_v35, %v697_v39 }
 0x947   :  { %v702_v28 = vsel %vm701_vm2, %v1093_v35, %v698_v41 }
 0x948   :  { %v707_v29 = vsel %vm704_vm3, %v706_v45, %v702_v28 }
 0x949   :  { %v712_v30 = vmul.f32 %v710_v27, %v707_v29  ;;  %v723_v42 = vmul.f32 %v721_v1, %v707_v29  ;;  %v715_v46 = vsub.f32 1.0, %v707_v29 }
 0x94b   :  { %v713_v43 = vadd.f32 %v712_v30, %v1461_v10 }
 0x94d   :  { %1094 = vtanh.f32 %v713_v43 }
 0x953   :  { %v1095_v44 = vpop.eup %1094 }
 0x954   :  { %717 = vrot.lane.b32.xlu0 %v1095_v44, %s1140_s3 }
 0x9c6   :  { %v718_v47 = vpop.permute.xlu0 %717 }
 0x9c7   :  { %v720_v48 = vmul.f32 %v718_v47, %v715_v46  ;;  %v940_v46 = vld [vmem:[%s1652_s8 + $0x38] sm:$0xff]  ;;  %v901_v47 = vld [vmem:[%s1650_s6 + $0x30] sm:$0xff] }
 0x9c8   :  { %953 = vmatpush.msrb.mxu1 %v940_v46 }
 0x9c9   :  { %v724_v49 = vadd.f32 %v723_v42, %v720_v48  ;;  %v900_v48 = vld [vmem:[%s1650_s6 + $0x28] sm:$0xff] }
 0x9cb   :  { %v726_v50 = vrot.slane %v724_v49, 2 }
 0x9cd   :  { %727 = vrot.lane.b32.xlu1 %v726_v50, %s1140_s3  ;;  %v899_v50 = vld [vmem:[%s1650_s6 + $0x20] sm:$0xff] }
 0xa3f   :  { %v728_v52 = vpop.permute.xlu1 %727 }
 0xa40   :  { %1043 = vmatmul.msk.f32.vlgmr.msrb.gmra.mxu3 %vm65_vm0, %v728_v52  ;;  %1044 = vmatmul.msk.f32.vlgmr.msra.gmra.mxu1 %vm65_vm0, %v728_v52  ;;  %v937_v52 = vld [vmem:[%s1652_s8 + $0x20] sm:$0xff] }
 0xabd   :  { %v768_v61 = vpop.f32.mrf.mxu1 }
 0xabe   :  { %v769_v4 = vadd.f32 %v768_v61, %v1466_v19 }
 0xac0   :  { %v795_v8 = vrot.slane %v769_v4, 4 }
 0xac3   :  { %v748_v53 = vpop.f32.mrf.mxu3 }
 0xac4   :  { %v749_v54 = vadd.f32 %v748_v53, %v1444_v51  ;;  %v898_v53 = vld [vmem:[%s1650_s6 + $0x18] sm:$0xff] }
 0xac6   :  { %v772_v13 = vrot.slane %v749_v54, 4  ;;  %v936_v54 = vld [vmem:[%s1652_s8 + $0x18] sm:$0xff] }
 0xac8   :  { %v774_v55 = vadd.f32 %v772_v13, %v1448_v62  ;;  %v806_v62 = vrot.slane %v724_v49, 6  ;;  %v938_v49 = vld [vmem:[%s1652_s8 + $0x28] sm:$0xff]  ;;  %v897_v13 = vld [vmem:[%s1650_s6 + $0x10] sm:$0xff] }
 0xaca   :  { %v1045_v56 = vmul.f32 -1.442695, %v774_v55  ;;  %v935_v55 = vld [vmem:[%s1652_s8 + $0x10] sm:$0xff] }
 0xacc   :  { %1096 = vpow2.f32 %v1045_v56  ;;  %v896_v56 = vld [vmem:[%s1650_s6 + $0x8] sm:$0xff] }
 0xad2   :  { %v1097_v57 = vpop.eup %1096 }
 0xad3   :  { %v778_v58 = vadd.f32 1.0, %v1097_v57  ;;  %v934_v57 = vld [vmem:[%s1652_s8 + $0x8] sm:$0xff] }
 0xad5   :  { %1098 = vrcp.f32 %v778_v58  ;;  %v790_v3 = vand.u32 2147483648, %v778_v58  ;;  %v788_v5 = vand.u32 2147483647, %v778_v58  ;;  %vm784_vm5 = vweird.f32 %v778_v58 }
 0xad7   :  { %v791_v7 = vor.u32 1.1754944e-38, %v790_v3  ;;  %vm789_vm7 = vcmp.eq.f32.partialorder %v788_v5, 8.507059e+37  ;;  %v1058_v5 = vld [vmem:[%s1653_s9] ss:$0 sm:$0xff] }
 0xadb   :  { %v1099_v59 = vpop.eup %1098 }
 0xadc   :  { %v780_v60 = vmul.f32 %v1099_v59, %v778_v58  ;;  %vm785_vm4 = vweird.f32 %v1099_v59  ;;  %v895_v58 = vld [vmem:[%s1650_s6] sm:$0xff] }
 0xadd   :  { %vm786_vm6 = vmor %vm784_vm5, %vm785_vm4 }
 0xade   :  { %v781_v2 = vsub.f32 1.0, %v780_v60 }
 0xae0   :  { %v782_v0 = vmul.f32 %v1099_v59, %v781_v2 }
 0xae2   :  { %v783_v6 = vadd.f32 %v1099_v59, %v782_v0 }
 0xae4   :  { %v787_v14 = vsel %vm786_vm6, %v1099_v59, %v783_v6  ;;  %v933_v59 = vld [vmem:[%s1652_s8] sm:$0xff] }
 0xae5   :  { %v792_v15 = vsel %vm789_vm7, %v791_v7, %v787_v14  ;;  %v1059_v14 = vld [vmem:[%s1651_s7] ss:$0 sm:$0xff] }
 0xae6   :  { %v797_v17 = vmul.f32 %v795_v8, %v792_v15  ;;  %v808_v18 = vmul.f32 %v806_v62, %v792_v15  ;;  %v800_v24 = vsub.f32 1.0, %v792_v15 }
 0xae8   :  { %v798_v22 = vadd.f32 %v797_v17, %v1458_v9 }
 0xaea   :  { %1100 = vtanh.f32 %v798_v22 }
 0xaf0   :  { %v1101_v23 = vpop.eup %1100 }
 0xaf1   :  { %802 = vrot.lane.b32.xlu2 %v1101_v23, %s1140_s3 }
 0xb4b   :  { %v803_v25 = vpop.permute.xlu2 %802 }
 0xb4c   :  { %v805_v26 = vmul.f32 %v803_v25, %v800_v24  ;;  %v968_v24 = vld [vmem:[%s1654_s10] sm:$0x3]  ;;  %s1141_s10 = smov [#allocation2]  }
 0xb4d   :  { %s1006_s23 = sshll.u32 %s1141_s10, 4  ;;  %s1007_s23 = int_to_ptr.vmem [resolvable:$true] %s1006_s23 }
 0xb4e   :  { %v809_v11 = vadd.f32 %v808_v18, %v805_v26 }
 0xb50   :  { %v811_v12 = vrot.slane %v809_v11, 4 }
 0xb52   :  { %812 = vrot.lane.b32.xlu0 %v811_v12, %s1140_s3 }
 0xbc4   :  { %v813_v16 = vpop.permute.xlu0 %812 }
 0xbc5   :  { %1046 = vmatmul.msk.f32.vlgmr.msra.gmra.mxu2 %vm65_vm0, %v813_v16  ;;  %1047 = vmatmul.msk.f32.vlgmr.msra.gmra.mxu0 %vm65_vm0, %v813_v16 }
 0xc42   :  { %v853_v38 = vpop.f32.mrf.mxu0 }
 0xc43   :  { %v854_v40 = vadd.f32 %v853_v38, %v1466_v19  ;;  %v902_v19 = vld [vmem:[%s1650_s6 + $0x38] sm:$0xff] }
 0xc44   :  { %921 = vmatpush.msra.mxu3 %v902_v19 }
 0xc45   :  { %v880_v27 = vrot.slane %v854_v40, 2 }
 0xc46   :  { %922 = vmatpush.msra.mxu3 %v901_v47 }
 0xc48   :  { %v833_v20 = vpop.f32.mrf.mxu2  ;;  %923 = vmatpush.msra.mxu3 %v900_v48 }
 0xc49   :  { %v834_v21 = vadd.f32 %v833_v20, %v1444_v51 }
 0xc4a   :  { %924 = vmatpush.msra.mxu3 %v899_v50 }
 0xc4b   :  { %v857_v9 = vrot.slane %v834_v21, 2 }
 0xc4c   :  { %925 = vmatpush.msra.mxu3 %v898_v53 }
 0xc4d   :  { %v859_v34 = vadd.f32 %v857_v9, %v1450_v63  ;;  %v891_v63 = vrot.slane %v809_v11, 6 }
 0xc4e   :  { %926 = vmatpush.msra.mxu3 %v897_v13 }
 0xc4f   :  { %v1048_v31 = vmul.f32 -1.442695, %v859_v34 }
 0xc50   :  { %927 = vmatpush.msra.mxu3 %v896_v56 }
 0xc51   :  { %1102 = vpow2.f32 %v1048_v31 }
 0xc52   :  { %928 = vmatpush.msra.mxu3 %v895_v58 }
 0xc57   :  { %v1103_v35 = vpop.eup %1102 }
 0xc58   :  { %v863_v36 = vadd.f32 1.0, %v1103_v35 }
 0xc5a   :  { %1104 = vrcp.f32 %v863_v36  ;;  %v875_v39 = vand.u32 2147483648, %v863_v36  ;;  %v873_v45 = vand.u32 2147483647, %v863_v36  ;;  %vm869_vm9 = vweird.f32 %v863_v36 }
 0xc5c   :  { %v876_v51 = vor.u32 1.1754944e-38, %v875_v39  ;;  %vm874_vm11 = vcmp.eq.f32.partialorder %v873_v45, 8.507059e+37 }
 0xc60   :  { %v1105_v32 = vpop.eup %1104 }
 0xc61   :  { %v865_v37 = vmul.f32 %v1105_v32, %v863_v36  ;;  %vm870_vm8 = vweird.f32 %v1105_v32 }
 0xc62   :  { %vm871_vm10 = vmor %vm869_vm9, %vm870_vm8 }
 0xc63   :  { %v866_v33 = vsub.f32 1.0, %v865_v37 }
 0xc65   :  { %v867_v41 = vmul.f32 %v1105_v32, %v866_v33 }
 0xc67   :  { %v868_v1 = vadd.f32 %v1105_v32, %v867_v41 }
 0xc69   :  { %v872_v28 = vsel %vm871_vm10, %v1105_v32, %v868_v1 }
 0xc6a   :  { %v877_v29 = vsel %vm874_vm11, %v876_v51, %v872_v28 }
 0xc6b   :  { %v882_v30 = vmul.f32 %v880_v27, %v877_v29  ;;  %v893_v42 = vmul.f32 %v891_v63, %v877_v29  ;;  %v885_v60 = vsub.f32 1.0, %v877_v29 }
 0xc6d   :  { %v883_v43 = vadd.f32 %v882_v30, %v1461_v10  ;;  %v939_v10 = vld [vmem:[%s1652_s8 + $0x30] sm:$0xff] }
 0xc6e   :  { %954 = vmatpush.msrb.mxu1 %v939_v10 }
 0xc6f   :  { %1106 = vtanh.f32 %v883_v43 }
 0xc70   :  { %955 = vmatpush.msrb.mxu1 %v938_v49 }
 0xc72   :  { %956 = vmatpush.msrb.mxu1 %v937_v52 }
 0xc74   :  { %957 = vmatpush.msrb.mxu1 %v936_v54 }
 0xc75   :  { %v1107_v44 = vpop.eup %1106 }
 0xc76   :  { %887 = vrot.lane.b32.xlu1 %v1107_v44, %s1140_s3  ;;  %958 = vmatpush.msrb.mxu1 %v935_v55 }
 0xc78   :  { %959 = vmatpush.msrb.mxu1 %v934_v57 }
 0xc7a   :  { %960 = vmatpush.msrb.mxu1 %v933_v59 }
 0xce8   :  { %v888_v61 = vpop.permute.xlu1 %887 }
 0xce9   :  { %v890_v2 = vmul.f32 %v888_v61, %v885_v60 }
 0xceb   :  { %v894_v3 = vadd.f32 %v893_v42, %v890_v2 }
 0xced   :  { %v908_v4 = vrot.slane %v894_v3, 6 }
 0xcef   :  { %909 = vrot.lane.b32.xlu2 %v908_v4, %s1140_s3 }
 0xd49   :  { %v910_v0 = vpop.permute.xlu2 %909 }
 0xd4a   :  { %1049 = vmatmul.msk.f32.vlgmr.msra.gmra.mxu3 %vm65_vm0, %v910_v0  ;;  %1050 = vmatmul.msk.f32.vlgmr.msrb.gmra.mxu1 %vm65_vm0, %v910_v0  ;;  %vm971_vm0 = vcmask 123904  }
 0xdc7   :  { %v962_v6 = vpop.f32.mrf.mxu1 }
 0xdc8   :  { %v963_v7 = vadd.f32 %v1058_v5, %v962_v6 }
 0xdca   :  { %v965_v62 = vmul.f32 0.5, %v963_v7  ;;  %v975_v8 = vmul.f32 1.442695, %v963_v7 }
 0xdcc   :  { %v966_v15 = vmul.f32 1.442695, %v965_v62  ;;  %1108 = vpow2.f32 %v975_v8 }
 0xdcd   :  { %v930_v17 = vpop.f32.mrf.mxu3 }
 0xdce   :  { %1110 = vpow2.f32 %v966_v15  ;;  %v931_v18 = vadd.f32 %v1059_v14, %v930_v17 }
 0xdd0   :  { %v973_v22 = vmul.f32 %v931_v18, %v931_v18 }
 0xdd2   :  { %v1109_v23 = vpop.eup %1108  ;;  %v974_v25 = vsub.f32 %v963_v7, %v973_v22 }
 0xdd4   :  { %v1111_v26 = vpop.eup %1110  ;;  %v977_v11 = vsub.f32 %v974_v25, %v1109_v23 }
 0xdd5   :  { %v969_v12 = vmul.f32 %v1111_v26, %v968_v24 }
 0xdd6   :  { %v978_v16 = vadd.f32 1.0, %v977_v11 }
 0xdd7   :  { %v970_v20 = vadd.f32 %v969_v12, %v931_v18 }
 0xdd8   :  { %v979_v21 = vsel %vm971_vm0, %v978_v16, 0.0 }
 0xdd9   :  { %980 = vadd.xlane.f32.xlu0 %v979_v21  ;;  %972 = vst.msk [vmem:[%s1655_s11] sm:$0x3] %vm971_vm0, %v970_v20 }
 0xe4c   :  { %v981_v9 = vpop.xlane.xlu0 %980 }
 0xe4d   :  { %v982_v34 = vmul.f32 -0.5, %v981_v9 }
 0xe4f   :  { %v984_v31 = vsel %vm983_vm12, %v982_v34, 0.0 }
 0xe50   :  { %985 = vadd.xlane.f32.xlu1 %v984_v31 }
 0xec3   :  { %v986_v35 = vpop.xlane.xlu1 %985 }
 0xec4   :  { %v987_v36 = vrot.slane %v986_v35, 4 }
 0xec6   :  { %v988_v32 = vadd.f32 %v987_v36, %v986_v35 }
 0xec8   :  { %v989_v37 = vrot.slane %v988_v32, 2 }
 0xeca   :  { %v990_v38 = vadd.f32 %v989_v37, %v988_v32 }
 0xecc   :  { %v991_v33 = vrot.slane %v990_v38, 1 }
 0xece   :  { %v992_v39 = vadd.f32 %v991_v33, %v990_v38 }
 0xed0   :  { %1051 = vpush %v992_v39 }
 0xf01   :  { %s1052_s11 = spop %1051 }
 0xf02   :  { %s994_s26 = smul.f32 0.5, %s1052_s11 }
 0xf04   :  { %v995_v40 = vstv %s994_s26 }
 0xf05   :  { %998 = vst.msk [vmem:[#allocation2] sm:$0x1] %vm997_vm13, %v995_v40 }
 0xf06   :  { %1011 = dma.vmem_to_hbm [thread:$0]  %s1007_s23, 16, %s1009_s25, [#allocation3]  }
 0xf07   :  { %1136 = dma.done.wait [#allocation3], 16  }
 0xf08   :  { %1137 = vsyncadd [#allocation3], 4294967280 }
 0xf09   :  { %1018 = vsyncpa [#allocation3], 1 }

</bundles_post_ra>
